<compile_context>
chip_gen: v5e
topology: v5e:2x2
jax: 0.10.0
libtpu: 0.0.40
codegen_flags: <defaults>
</compile_context>

<pallas_src>
import jax
import jax.numpy as jnp
from jax import lax
from jax.experimental import pallas as pl
from jax.experimental.pallas import tpu as pltpu

STATE_DIM = 126
ACT_DIM = 20
H1 = 512
H2 = 256


def _critic_kernel(x_ref, u_ref,
                   w1x_ref, w1u_ref, b1_ref,
                   w2f_ref, b2f_ref, w2l_ref, b2l_ref,
                   w3_ref, b3_ref,
                   q_ref):
    # ---- fused layer 1 for both heads: [Bt, 2*H1] in one MXU pass per operand ----
    xb = x_ref[...].astype(jnp.bfloat16)
    ub = u_ref[...].astype(jnp.bfloat16)
    z1 = jnp.dot(xb, w1x_ref[...], preferred_element_type=jnp.float32)
    z1 = z1 + jnp.dot(ub, w1u_ref[...], preferred_element_type=jnp.float32)
    z1 = jnp.maximum(z1 + b1_ref[...], 0.0)          # bias/ReLU in f32 (v5e-safe)

    h = z1[:, :H1].astype(jnp.bfloat16)               # Q1-head activations (lane-aligned slice)
    g = z1[:, H1:].astype(jnp.bfloat16)               # Q2-head activations

    # ---- layer 2 per head ----
    h2 = jnp.maximum(
        jnp.dot(h, w2f_ref[...], preferred_element_type=jnp.float32) + b2f_ref[...], 0.0)
    g2 = jnp.maximum(
        jnp.dot(g, w2l_ref[...], preferred_element_type=jnp.float32) + b2l_ref[...], 0.0)

    # ---- layer 3 (N=1): VPU multiply + XLU lane reduction instead of an MXU matmul ----
    w3 = w3_ref[...]                                   # [2, H2] f32: row 0 = f3, row 1 = l3
    q1 = jnp.sum(h2 * w3[0:1, :], axis=-1, keepdims=True)   # [Bt, 1]
    q2 = jnp.sum(g2 * w3[1:2, :], axis=-1, keepdims=True)   # [Bt, 1]

    # merge into a single [Bt, 2] store (one output DMA; no in-kernel concat needed)
    col = lax.broadcasted_iota(jnp.int32, q_ref.shape, 1)
    q_ref[...] = jnp.where(col == 0, q1, q2) + b3_ref[...]


def _round_up(n, m):
    return ((n + m - 1) // m) * m


def critic_forward(x, u, params, block_b=256):
    """Pallas implementation of Critic.forward(x, u) -> (q1, q2)."""
    B = x.shape[0]
    Bt = min(block_b, _round_up(max(B, 1), 16))        # sublane-friendly batch tile
    B_pad = _round_up(B, Bt)
    if B_pad != B:
        pad = B_pad - B
        x = jnp.pad(x, ((0, pad), (0, 0)))
        u = jnp.pad(u, ((0, pad), (0, 0)))

    def row_spec(d):
        return pl.BlockSpec((Bt, d), lambda i: (i, 0))

    def fixed(shape):
        # weights/biases: same block every grid step -> stay VMEM-resident, no re-DMA
        return pl.BlockSpec(shape, lambda i: (0, 0))

    q = pl.pallas_call(
        _critic_kernel,
        out_shape=jax.ShapeDtypeStruct((B_pad, 2), jnp.float32),
        grid=(B_pad // Bt,),
        in_specs=[
            row_spec(STATE_DIM),                 # x
            row_spec(ACT_DIM),                   # u
            fixed((STATE_DIM, 2 * H1)),          # w1x  (bf16)
            fixed((ACT_DIM, 2 * H1)),            # w1u  (bf16)
            fixed((1, 2 * H1)),                  # b1   (f32)
            fixed((H1, H2)),                     # w2f  (bf16)
            fixed((1, H2)),                      # b2f
            fixed((H1, H2)),                     # w2l  (bf16)
            fixed((1, H2)),                      # b2l
            fixed((2, H2)),                      # w3   (f32, rows = [f3, l3])
            fixed((1, 2)),                       # b3   (f32, cols = [f3, l3])
        ],
        out_specs=row_spec(2),
        compiler_params=pltpu.CompilerParams(
            dimension_semantics=("parallel",)),
    )(x, u,
      params["w1x"], params["w1u"], params["b1"],
      params["w2f"], params["b2f"], params["w2l"], params["b2l"],
      params["w3"], params["b3"])

    return q[:B, 0:1], q[:B, 1:2]


def init_params(key):
    """nn.Linear-style init (U[-1/sqrt(fan_in), 1/sqrt(fan_in)]), stored in the
    kernel's fused/split layout: w1 split by input (x vs u) and fused over both
    heads on the output dim; w3 stored as [2, H2] rows; weights in bf16."""
    keys = jax.random.split(key, 12)

    def linear(kw, kb, fan_in, fan_out):
        bound = float(fan_in) ** -0.5
        w = jax.random.uniform(kw, (fan_in, fan_out),
                               minval=-bound, maxval=bound, dtype=jnp.float32)
        b = jax.random.uniform(kb, (1, fan_out),
                               minval=-bound, maxval=bound, dtype=jnp.float32)
        return w, b

    w1f, b1f = linear(keys[0], keys[1], STATE_DIM + ACT_DIM, H1)
    w2f, b2f = linear(keys[2], keys[3], H1, H2)
    w3f, b3f = linear(keys[4], keys[5], H2, 1)
    w1l, b1l = linear(keys[6], keys[7], STATE_DIM + ACT_DIM, H1)
    w2l, b2l = linear(keys[8], keys[9], H1, H2)
    w3l, b3l = linear(keys[10], keys[11], H2, 1)

    w1 = jnp.concatenate([w1f, w1l], axis=1)           # [146, 1024]
    return {
        "w1x": w1[:STATE_DIM].astype(jnp.bfloat16),    # [126, 1024]
        "w1u": w1[STATE_DIM:].astype(jnp.bfloat16),    # [20, 1024]
        "b1":  jnp.concatenate([b1f, b1l], axis=1),    # [1, 1024] f32
        "w2f": w2f.astype(jnp.bfloat16),               # [512, 256]
        "b2f": b2f,
        "w2l": w2l.astype(jnp.bfloat16),               # [512, 256]
        "b2l": b2l,
        "w3":  jnp.concatenate([w3f.T, w3l.T], axis=0),  # [2, 256] f32
        "b3":  jnp.concatenate([b3f, b3l], axis=1),      # [1, 2] f32
    }


def critic_forward_ref(x, u, params):
    """Pure-JAX reference mirroring the same bf16-weight / f32-accumulate math."""
    def dot(a, b):
        return jnp.dot(a.astype(jnp.bfloat16), b, preferred_element_type=jnp.float32)

    z1 = jax.nn.relu(dot(x, params["w1x"]) + dot(u, params["w1u"]) + params["b1"])
    h, g = z1[:, :H1], z1[:, H1:]
    h2 = jax.nn.relu(dot(h, params["w2f"]) + params["b2f"])
    g2 = jax.nn.relu(dot(g, params["w2l"]) + params["b2l"])
    q1 = jnp.sum(h2 * params["w3"][0:1, :], axis=-1, keepdims=True) + params["b3"][:, 0:1]
    q2 = jnp.sum(g2 * params["w3"][1:2, :], axis=-1, keepdims=True) + params["b3"][:, 1:2]
    return q1, q2


if __name__ == "__main__":
    key = jax.random.PRNGKey(0)
    k_params, k_x, k_u = jax.random.split(key, 3)

    batch = 2
    params = init_params(k_params)
    x = jax.random.normal(k_x, (batch, STATE_DIM), dtype=jnp.float32)
    u = jax.random.normal(k_u, (batch, ACT_DIM), dtype=jnp.float32)

    q1, q2 = critic_forward(x, u, params)
    q1 = jax.block_until_ready(q1)
    q2 = jax.block_until_ready(q2)

    q1_ref, q2_ref = critic_forward_ref(x, u, params)
    assert q1.shape == (batch, 1) and q2.shape == (batch, 1)
    assert jnp.allclose(q1, q1_ref, atol=1e-3, rtol=1e-3)
    assert jnp.allclose(q2, q2_ref, atol=1e-3, rtol=1e-3)

    print("KERNEL_OK")
</pallas_src>

<mosaic_0001>
module attributes {stable_mosaic.version = 11 : i64} {
  func.func @_critic_kernel(%arg0: i32, %arg1: memref<16x126xf32, #tpu.memory_space<vmem>>, %arg2: memref<16x20xf32, #tpu.memory_space<vmem>>, %arg3: memref<126x1024xbf16, #tpu.memory_space<vmem>>, %arg4: memref<20x1024xbf16, #tpu.memory_space<vmem>>, %arg5: memref<1x1024xf32, #tpu.memory_space<vmem>>, %arg6: memref<512x256xbf16, #tpu.memory_space<vmem>>, %arg7: memref<1x256xf32, #tpu.memory_space<vmem>>, %arg8: memref<512x256xbf16, #tpu.memory_space<vmem>>, %arg9: memref<1x256xf32, #tpu.memory_space<vmem>>, %arg10: memref<2x256xf32, #tpu.memory_space<vmem>>, %arg11: memref<1x2xf32, #tpu.memory_space<vmem>>, %arg12: memref<16x2xf32, #tpu.memory_space<vmem>>) attributes {dimension_semantics = [#tpu.dimension_semantics<parallel>], iteration_bounds = array<i64: 1>, scalar_prefetch = 0 : i64, scratch_operands = 0 : i64, tpu.core_type = #tpu.core_type<tc>, window_params = [{transform_indices = @transform_0, window_bounds = array<i64: 16, 126>}, {transform_indices = @transform_1, window_bounds = array<i64: 16, 20>}, {pipeline_mode = #tpu.pipeline_mode<synchronous>, transform_indices = @transform_2, window_bounds = array<i64: 126, 1024>}, {pipeline_mode = #tpu.pipeline_mode<synchronous>, transform_indices = @transform_3, window_bounds = array<i64: 20, 1024>}, {pipeline_mode = #tpu.pipeline_mode<synchronous>, transform_indices = @transform_4, window_bounds = array<i64: 1, 1024>}, {pipeline_mode = #tpu.pipeline_mode<synchronous>, transform_indices = @transform_5, window_bounds = array<i64: 512, 256>}, {pipeline_mode = #tpu.pipeline_mode<synchronous>, transform_indices = @transform_6, window_bounds = array<i64: 1, 256>}, {pipeline_mode = #tpu.pipeline_mode<synchronous>, transform_indices = @transform_7, window_bounds = array<i64: 512, 256>}, {pipeline_mode = #tpu.pipeline_mode<synchronous>, transform_indices = @transform_8, window_bounds = array<i64: 1, 256>}, {pipeline_mode = #tpu.pipeline_mode<synchronous>, transform_indices = @transform_9, window_bounds = array<i64: 2, 256>}, {pipeline_mode = #tpu.pipeline_mode<synchronous>, transform_indices = @transform_10, window_bounds = array<i64: 1, 2>}, {transform_indices = @transform_11, window_bounds = array<i64: 16, 2>}]} {
    %c0 = arith.constant 0 : index
    %c0_0 = arith.constant 0 : index
    %0 = vector.load %arg1[%c0, %c0_0] : memref<16x126xf32, #tpu.memory_space<vmem>>, vector<16x126xf32>
    %1 = arith.truncf %0 : vector<16x126xf32> to vector<16x126xbf16>
    %c0_1 = arith.constant 0 : index
    %c0_2 = arith.constant 0 : index
    %2 = vector.load %arg2[%c0_1, %c0_2] : memref<16x20xf32, #tpu.memory_space<vmem>>, vector<16x20xf32>
    %3 = arith.truncf %2 : vector<16x20xf32> to vector<16x20xbf16>
    %c0_3 = arith.constant 0 : index
    %c0_4 = arith.constant 0 : index
    %4 = vector.load %arg3[%c0_3, %c0_4] : memref<126x1024xbf16, #tpu.memory_space<vmem>>, vector<126x1024xbf16>
    %cst = arith.constant dense<0.000000e+00> : vector<16x1024xf32>
    %5 = tpu.matmul %1, %4, %cst {dimension_numbers = #tpu.dot_dimension_numbers<[1], [0], [0], [1], [0, 0, 1, 1], [], []>} : vector<16x126xbf16>, vector<126x1024xbf16>, vector<16x1024xf32> -> vector<16x1024xf32>
    %c0_5 = arith.constant 0 : index
    %c0_6 = arith.constant 0 : index
    %6 = vector.load %arg4[%c0_5, %c0_6] : memref<20x1024xbf16, #tpu.memory_space<vmem>>, vector<20x1024xbf16>
    %cst_7 = arith.constant dense<0.000000e+00> : vector<16x1024xf32>
    %7 = tpu.matmul %3, %6, %cst_7 {dimension_numbers = #tpu.dot_dimension_numbers<[1], [0], [0], [1], [0, 0, 1, 1], [], []>} : vector<16x20xbf16>, vector<20x1024xbf16>, vector<16x1024xf32> -> vector<16x1024xf32>
    %8 = arith.addf %5, %7 : vector<16x1024xf32>
    %c0_8 = arith.constant 0 : index
    %c0_9 = arith.constant 0 : index
    %9 = vector.load %arg5[%c0_8, %c0_9] : memref<1x1024xf32, #tpu.memory_space<vmem>>, vector<1x1024xf32>
    %10 = vector.broadcast %9 : vector<1x1024xf32> to vector<16x1024xf32>
    %11 = arith.addf %8, %10 : vector<16x1024xf32>
    %cst_10 = arith.constant 0.000000e+00 : f32
    %12 = vector.broadcast %cst_10 : f32 to vector<16x1024xf32>
    %13 = arith.maximumf %11, %12 : vector<16x1024xf32>
    %14 = vector.extract_strided_slice %13 {offsets = [0, 0], sizes = [16, 512], strides = [1, 1]} : vector<16x1024xf32> to vector<16x512xf32>
    %15 = arith.truncf %14 : vector<16x512xf32> to vector<16x512xbf16>
    %16 = vector.extract_strided_slice %13 {offsets = [0, 512], sizes = [16, 512], strides = [1, 1]} : vector<16x1024xf32> to vector<16x512xf32>
    %17 = arith.truncf %16 : vector<16x512xf32> to vector<16x512xbf16>
    %c0_11 = arith.constant 0 : index
    %c0_12 = arith.constant 0 : index
    %18 = vector.load %arg6[%c0_11, %c0_12] : memref<512x256xbf16, #tpu.memory_space<vmem>>, vector<512x256xbf16>
    %cst_13 = arith.constant dense<0.000000e+00> : vector<16x256xf32>
    %19 = tpu.matmul %15, %18, %cst_13 {dimension_numbers = #tpu.dot_dimension_numbers<[1], [0], [0], [1], [0, 0, 1, 1], [], []>} : vector<16x512xbf16>, vector<512x256xbf16>, vector<16x256xf32> -> vector<16x256xf32>
    %c0_14 = arith.constant 0 : index
    %c0_15 = arith.constant 0 : index
    %20 = vector.load %arg7[%c0_14, %c0_15] : memref<1x256xf32, #tpu.memory_space<vmem>>, vector<1x256xf32>
    %21 = vector.broadcast %20 : vector<1x256xf32> to vector<16x256xf32>
    %22 = arith.addf %19, %21 : vector<16x256xf32>
    %cst_16 = arith.constant 0.000000e+00 : f32
    %23 = vector.broadcast %cst_16 : f32 to vector<16x256xf32>
    %24 = arith.maximumf %22, %23 : vector<16x256xf32>
    %c0_17 = arith.constant 0 : index
    %c0_18 = arith.constant 0 : index
    %25 = vector.load %arg8[%c0_17, %c0_18] : memref<512x256xbf16, #tpu.memory_space<vmem>>, vector<512x256xbf16>
    %cst_19 = arith.constant dense<0.000000e+00> : vector<16x256xf32>
    %26 = tpu.matmul %17, %25, %cst_19 {dimension_numbers = #tpu.dot_dimension_numbers<[1], [0], [0], [1], [0, 0, 1, 1], [], []>} : vector<16x512xbf16>, vector<512x256xbf16>, vector<16x256xf32> -> vector<16x256xf32>
    %c0_20 = arith.constant 0 : index
    %c0_21 = arith.constant 0 : index
    %27 = vector.load %arg9[%c0_20, %c0_21] : memref<1x256xf32, #tpu.memory_space<vmem>>, vector<1x256xf32>
    %28 = vector.broadcast %27 : vector<1x256xf32> to vector<16x256xf32>
    %29 = arith.addf %26, %28 : vector<16x256xf32>
    %cst_22 = arith.constant 0.000000e+00 : f32
    %30 = vector.broadcast %cst_22 : f32 to vector<16x256xf32>
    %31 = arith.maximumf %29, %30 : vector<16x256xf32>
    %c0_23 = arith.constant 0 : index
    %c0_24 = arith.constant 0 : index
    %32 = vector.load %arg10[%c0_23, %c0_24] : memref<2x256xf32, #tpu.memory_space<vmem>>, vector<2x256xf32>
    %33 = vector.extract_strided_slice %32 {offsets = [0, 0], sizes = [1, 256], strides = [1, 1]} : vector<2x256xf32> to vector<1x256xf32>
    %34 = vector.broadcast %33 : vector<1x256xf32> to vector<16x256xf32>
    %35 = arith.mulf %24, %34 : vector<16x256xf32>
    %cst_25 = arith.constant dense<0.000000e+00> : vector<16xf32>
    %36 = vector.multi_reduction <add>, %35, %cst_25 [1] : vector<16x256xf32> to vector<16xf32>
    %37 = vector.shape_cast %36 : vector<16xf32> to vector<16x1xf32>
    %38 = vector.extract_strided_slice %32 {offsets = [1, 0], sizes = [1, 256], strides = [1, 1]} : vector<2x256xf32> to vector<1x256xf32>
    %39 = vector.broadcast %38 : vector<1x256xf32> to vector<16x256xf32>
    %40 = arith.mulf %31, %39 : vector<16x256xf32>
    %cst_26 = arith.constant dense<0.000000e+00> : vector<16xf32>
    %41 = vector.multi_reduction <add>, %40, %cst_26 [1] : vector<16x256xf32> to vector<16xf32>
    %42 = vector.shape_cast %41 : vector<16xf32> to vector<16x1xf32>
    %43 = tpu.iota {dimensions = array<i32: 1>} : vector<16x2xi32>
    %c0_i32 = arith.constant 0 : i32
    %44 = vector.broadcast %c0_i32 : i32 to vector<16x2xi32>
    %45 = arith.cmpi eq, %43, %44 : vector<16x2xi32>
    %46 = vector.shape_cast %37 : vector<16x1xf32> to vector<16x1xf32>
    %47 = vector.broadcast %46 : vector<16x1xf32> to vector<16x2xf32>
    %48 = vector.shape_cast %42 : vector<16x1xf32> to vector<16x1xf32>
    %49 = vector.broadcast %48 : vector<16x1xf32> to vector<16x2xf32>
    %50 = arith.select %45, %47, %49 : vector<16x2xi1>, vector<16x2xf32>
    %c0_27 = arith.constant 0 : index
    %c0_28 = arith.constant 0 : index
    %51 = vector.load %arg11[%c0_27, %c0_28] : memref<1x2xf32, #tpu.memory_space<vmem>>, vector<1x2xf32>
    %52 = vector.broadcast %51 : vector<1x2xf32> to vector<16x2xf32>
    %53 = arith.addf %50, %52 : vector<16x2xf32>
    %c0_29 = arith.constant 0 : index
    %c0_30 = arith.constant 0 : index
    %54 = vector.load %arg12[%c0_29, %c0_30] : memref<16x2xf32, #tpu.memory_space<vmem>>, vector<16x2xf32>
    tpu.vector_store %arg12[%c0_29, %c0_30], %53 {strides = array<i32>} : memref<16x2xf32, #tpu.memory_space<vmem>>, vector<16x2xf32>,
    return
  }
  func.func @transform_0(%arg0: i32) -> (i32, i32) {
    %c0_i32 = arith.constant 0 : i32
    %c0_i32_0 = arith.constant 0 : i32
    return %arg0, %c0_i32 : i32, i32
  }
  func.func @transform_1(%arg0: i32) -> (i32, i32) {
    %c0_i32 = arith.constant 0 : i32
    %c0_i32_0 = arith.constant 0 : i32
    return %arg0, %c0_i32 : i32, i32
  }
  func.func @transform_2(%arg0: i32) -> (i32, i32) {
    %c0_i32 = arith.constant 0 : i32
    %c0_i32_0 = arith.constant 0 : i32
    %c0_i32_1 = arith.constant 0 : i32
    return %c0_i32, %c0_i32_0 : i32, i32
  }
  func.func @transform_3(%arg0: i32) -> (i32, i32) {
    %c0_i32 = arith.constant 0 : i32
    %c0_i32_0 = arith.constant 0 : i32
    %c0_i32_1 = arith.constant 0 : i32
    return %c0_i32, %c0_i32_0 : i32, i32
  }
  func.func @transform_4(%arg0: i32) -> (i32, i32) {
    %c0_i32 = arith.constant 0 : i32
    %c0_i32_0 = arith.constant 0 : i32
    %c0_i32_1 = arith.constant 0 : i32
    return %c0_i32, %c0_i32_0 : i32, i32
  }
  func.func @transform_5(%arg0: i32) -> (i32, i32) {
    %c0_i32 = arith.constant 0 : i32
    %c0_i32_0 = arith.constant 0 : i32
    %c0_i32_1 = arith.constant 0 : i32
    return %c0_i32, %c0_i32_0 : i32, i32
  }
  func.func @transform_6(%arg0: i32) -> (i32, i32) {
    %c0_i32 = arith.constant 0 : i32
    %c0_i32_0 = arith.constant 0 : i32
    %c0_i32_1 = arith.constant 0 : i32
    return %c0_i32, %c0_i32_0 : i32, i32
  }
  func.func @transform_7(%arg0: i32) -> (i32, i32) {
    %c0_i32 = arith.constant 0 : i32
    %c0_i32_0 = arith.constant 0 : i32
    %c0_i32_1 = arith.constant 0 : i32
    return %c0_i32, %c0_i32_0 : i32, i32
  }
  func.func @transform_8(%arg0: i32) -> (i32, i32) {
    %c0_i32 = arith.constant 0 : i32
    %c0_i32_0 = arith.constant 0 : i32
    %c0_i32_1 = arith.constant 0 : i32
    return %c0_i32, %c0_i32_0 : i32, i32
  }
  func.func @transform_9(%arg0: i32) -> (i32, i32) {
    %c0_i32 = arith.constant 0 : i32
    %c0_i32_0 = arith.constant 0 : i32
    %c0_i32_1 = arith.constant 0 : i32
    return %c0_i32, %c0_i32_0 : i32, i32
  }
  func.func @transform_10(%arg0: i32) -> (i32, i32) {
    %c0_i32 = arith.constant 0 : i32
    %c0_i32_0 = arith.constant 0 : i32
    %c0_i32_1 = arith.constant 0 : i32
    return %c0_i32, %c0_i32_0 : i32, i32
  }
  func.func @transform_11(%arg0: i32) -> (i32, i32) {
    %c0_i32 = arith.constant 0 : i32
    %c0_i32_0 = arith.constant 0 : i32
    return %arg0, %c0_i32 : i32, i32
  }
}

</mosaic_0001>

<bundles_post_ra>
// kernel: tpu_custom_call.1
= control target key start
LH: loop header
LB: loop body
LE: loop exit
PB: predicated region body
PF: predicated region fallthrough
CT: control target
= control target key end

     0   :  { %16 = vsyncpa [#allocation3], 0  ;;  %s3528_s0 = inlined_call_operand.hbm [shape: f32[16,126], index: 0, kind: input, shape index: {}]   ;;  %s3529_s1 = inlined_call_operand.hbm [shape: f32[16,20], index: 1, kind: input, shape index: {}]   ;;  %s3530_s2 = inlined_call_operand.hbm [shape: bf16[126,1024], index: 2, kind: input, shape index: {}]   ;;  %s3531_s3 = inlined_call_operand.hbm [shape: bf16[20,1024], index: 3, kind: input, shape index: {}]   ;;  %s3532_s4 = inlined_call_operand.hbm [shape: f32[1,1024], index: 4, kind: input, shape index: {}]   ;;  %s3533_s5 = inlined_call_operand.hbm [shape: bf16[512,256], index: 5, kind: input, shape index: {}]   ;;  %s3534_s6 = inlined_call_operand.vmem [shape: f32[1,256], index: 6, kind: input, shape index: {}]   ;;  %s3535_s7 = inlined_call_operand.hbm [shape: bf16[512,256], index: 7, kind: input, shape index: {}]   ;;  %s3536_s8 = inlined_call_operand.hbm [shape: f32[1,256], index: 8, kind: input, shape index: {}]   ;;  %s3537_s9 = inlined_call_operand.vmem [shape: f32[2,256], index: 9, kind: input, shape index: {}]   ;;  %s3538_s10 = inlined_call_operand.vmem [shape: f32[1,2], index: 10, kind: input, shape index: {}]   ;;  %s3539_s11 = inlined_call_operand.vmem [shape: f32[16,2], index: 11, kind: output, shape index: {}]  }
   0x1   :  { %17 = vsyncpa [#allocation5], 0 }
   0x2   :  { %18 = vsyncpa [#allocation8], 0 }
   0x3   :  { %19 = vsyncpa [#allocation11], 0 }
   0x4   :  { %20 = vsyncpa [#allocation14], 0  ;;  %s38_s19 = sshll.u32 %s3529_s1, 4  ;;  %s3254_s20 = smov [#allocation4]   ;;  %s39_s19 = int_to_ptr.hbm [resolvable:$true] %s38_s19 }
   0x5   :  { %s40_s21 = sshll.u32 %s3254_s20, 4  ;;  %s3255_s22 = smov 128   ;;  %s41_s21 = int_to_ptr.vmem [resolvable:$true] %s40_s21 }
   0x6   :  { %s3256_s23 = smov 8   ;;  %s64_s26 = sshll.u32 %s3531_s3, 4  ;;  %s65_s26 = int_to_ptr.hbm [resolvable:$true] %s64_s26 }
   0x7   :  { %46 = dma.hbm_to_vmem [thread:$0]  %s39_s19, 256, %s41_s21, [#allocation5], %s3255_s22, %s3255_s22, %s3256_s23  }
   0x8   :  { %s3257_s27 = smov [#allocation7]   ;;  %s88_s1 = sshll.u32 %s3533_s5, 4  ;;  %s89_s1 = int_to_ptr.hbm [resolvable:$true] %s88_s1 }
   0x9   :  { %s66_s28 = sshll.u32 %s3257_s27, 4  ;;  %s3258_s12 = smov 512   ;;  %s67_s28 = int_to_ptr.vmem [resolvable:$true] %s66_s28 }
   0xa   :  { %s3259_s13 = smov 32   ;;  %s25_s16 = sshll.u32 %s3528_s0, 4  ;;  %s26_s16 = int_to_ptr.hbm [resolvable:$true] %s25_s16 }
   0xb   :  { %72 = dma.hbm_to_vmem [thread:$0]  %s65_s26, 1536, %s67_s28, [#allocation8], %s3258_s12, %s3258_s12, %s3259_s13  }
   0xc   :  { %s3260_s17 = smov [#allocation10]   ;;  %s3261_s3 = smov [#allocation2]  }
   0xd   :  { %s90_s18 = sshll.u32 %s3260_s17, 4  ;;  %s27_s19 = sshll.u32 %s3261_s3, 4  ;;  %s91_s18 = int_to_ptr.vmem [resolvable:$true] %s90_s18  ;;  %s28_s19 = int_to_ptr.vmem [resolvable:$true] %s27_s19 }
   0xe   :  { %96 = dma.hbm_to_vmem [thread:$0]  %s89_s1, 8192, %s91_s18, [#allocation11], %s3255_s22, %s3255_s22, %s3256_s23  }
   0xf   :  { %s51_s21 = sshll.u32 %s3530_s2, 4  ;;  %s78_s25 = sshll.u32 %s3532_s4, 4  ;;  %s52_s21 = int_to_ptr.hbm [resolvable:$true] %s51_s21  ;;  %s79_s25 = int_to_ptr.hbm [resolvable:$true] %s78_s25 }
  0x10   :  { %33 = dma.hbm_to_vmem [thread:$0]  %s26_s16, 256, %s28_s19, [#allocation3], %s3255_s22, %s3255_s22, %s3256_s23  }
  0x11   :  { %s3262_s26 = smov [#allocation6]   ;;  %s3263_s28 = smov [#allocation9]  }
  0x12   :  { %s53_s27 = sshll.u32 %s3262_s26, 4  ;;  %s80_s29 = sshll.u32 %s3263_s28, 4  ;;  %s54_s27 = int_to_ptr.vmem [resolvable:$true] %s53_s27  ;;  %s81_s29 = int_to_ptr.vmem [resolvable:$true] %s80_s29 }
  0x13   :  { %59 = dma.hbm_to_vmem [thread:$0]  %s52_s21, 8192, %s54_s27, [#allocation5], %s3258_s12, %s3258_s12, %s3259_s13  }
  0x14   :  { %s103_s2 = sshll.u32 %s3535_s7, 4  ;;  %s117_s16 = sshll.u32 %s3536_s8, 4  ;;  %s104_s2 = int_to_ptr.hbm [resolvable:$true] %s103_s2  ;;  %s118_s16 = int_to_ptr.hbm [resolvable:$true] %s117_s16 }
  0x15   :  { %83 = dma.hbm_to_vmem [thread:$0]  %s79_s25, 128, %s81_s29, [#allocation8]  }
  0x16   :  { %s3264_s17 = smov [#allocation12]   ;;  %s3265_s12 = smov [#allocation13]  }
  0x17   :  { %s105_s4 = sshll.u32 %s3264_s17, 4  ;;  %s119_s13 = sshll.u32 %s3265_s12, 4  ;;  %s106_s4 = int_to_ptr.vmem [resolvable:$true] %s105_s4  ;;  %s120_s13 = int_to_ptr.vmem [resolvable:$true] %s119_s13 }
  0x18   :  { %111 = dma.hbm_to_vmem [thread:$0]  %s104_s2, 8192, %s106_s4, [#allocation11], %s3255_s22, %s3255_s22, %s3256_s23  }
  0x19   :  { %122 = dma.hbm_to_vmem [thread:$0]  %s118_s16, 32, %s120_s13, [#allocation14]  }
  0x1a   :  { %3244 = dma.done.wait [#allocation3], 256  }
  0x1b   :  { %3245 = vsyncadd [#allocation3], 4294967040 }
  0x1c   :  { %3246 = dma.done.wait [#allocation5], 8448  }
  0x1d   :  { %3247 = vsyncadd [#allocation5], 4294958848 }
  0x1e   :  { %3248 = dma.done.wait [#allocation8], 1664  }
  0x1f   :  { %3249 = vsyncadd [#allocation8], 4294965632 }
  0x20   :  { %3250 = dma.done.wait [#allocation11], 16384  }
  0x21   :  { %3251 = vsyncadd [#allocation11], 4294950912 }
  0x22   :  { %3252 = dma.done.wait [#allocation14], 32  }
  0x23   :  { %3253 = vsyncadd [#allocation14], 4294967264  ;;  %v238_v0 = vld [vmem:[#allocation7 + $0x40] sm:$0x33]  ;;  %v239_v1 = vld [vmem:[#allocation7 + $0x48] sm:$0x33] }
  0x24   :  { %v2025_v2 = vld [vmem:[#allocation7] sm:$0xf]  ;;  %v270_v3 = vunpack.c.l.b16 %v238_v0  ;;  %v271_v4 = vunpack.c.h.b16 %v238_v0  ;;  %v272_v5 = vunpack.c.l.b16 %v239_v1  ;;  %v273_v6 = vunpack.c.h.b16 %v239_v1  ;;  %v2903_v8 = vld [vmem:[#allocation7 + $0x4] sm:$0xf]  ;;  %v2033_v14 = vld [vmem:[#allocation7 + $0x8] sm:$0xf] }
  0x25   :  { %v2907_v7 = vld [vmem:[#allocation7 + $0x1c] sm:$0xf0]  ;;  %v2027_v9 = vld [vmem:[#allocation7 + $0x20] sm:$0xf0]  ;;  %vm306_vm0 = vcmask 1041408   ;;  %v163_v32 = vld [vmem:[#allocation4] sm:$0xff] }
  0x26   :  { %v286_v10 = vpack.c.b16 %v270_v3, %v270_v3  ;;  %v287_v11 = vpack.c.b16 %v271_v4, %v271_v4  ;;  %v288_v12 = vpack.c.b16 %v272_v5, %v272_v5  ;;  %v289_v13 = vpack.c.b16 %v273_v6, %v273_v6  ;;  %v240_v15 = vld [vmem:[#allocation7 + $0x50] sm:$0x33]  ;;  %v241_v16 = vld [vmem:[#allocation7 + $0x58] sm:$0x33]  ;;  %v2908_v19 = vld [vmem:[#allocation7 + $0x24] sm:$0xf0] }
  0x27   :  { %v2026_v17 = vor.u32 %v2907_v7, %v2025_v2  ;;  %v2030_v18 = vor.u32 %v2903_v8, %v2027_v9  ;;  %v2904_v20 = vld [vmem:[#allocation7 + $0xc] sm:$0xf]  ;;  %v274_v22 = vunpack.c.l.b16 %v240_v15  ;;  %v275_v23 = vunpack.c.h.b16 %v240_v15  ;;  %v164_v33 = vld [vmem:[#allocation4 + $0x8] sm:$0xff]  ;;  %v2041_v36 = vld [vmem:[#allocation7 + $0x10] sm:$0xf] }
  0x28   :  { %v2035_v21 = vld [vmem:[#allocation7 + $0x28] sm:$0xf0]  ;;  %v308_v24 = vsel %vm306_vm0, %v286_v10, 0  ;;  %v311_v25 = vsel %vm306_vm0, %v287_v11, 0  ;;  %v314_v26 = vsel %vm306_vm0, %v288_v12, 0  ;;  %v317_v27 = vsel %vm306_vm0, %v289_v13, 0 }
  0x29   :  { %337 = vmatpush.bf16.msra.mxu0 %v308_v24  ;;  %351 = vmatpush.bf16.msra.mxu1 %v311_v25  ;;  %v290_v28 = vpack.c.b16 %v274_v22, %v274_v22  ;;  %v291_v29 = vpack.c.b16 %v275_v23, %v275_v23  ;;  %v276_v30 = vunpack.c.l.b16 %v241_v16  ;;  %v277_v31 = vunpack.c.h.b16 %v241_v16  ;;  %v2909_v37 = vld [vmem:[#allocation7 + $0x2c] sm:$0xf0]  ;;  %v2905_v38 = vld [vmem:[#allocation7 + $0x14] sm:$0xf]  ;;  %v2049_v44 = vld [vmem:[#allocation7 + $0x18] sm:$0xf] }
  0x2a   :  { %365 = vmatpush.bf16.msra.mxu2 %v314_v26  ;;  %379 = vmatpush.bf16.msra.mxu3 %v317_v27  ;;  %v2034_v34 = vor.u32 %v2908_v19, %v2033_v14  ;;  %v2038_v35 = vor.u32 %v2904_v20, %v2035_v21  ;;  %v2043_v39 = vld [vmem:[#allocation7 + $0x30] sm:$0xf0]  ;;  %v2910_v45 = vld [vmem:[#allocation7 + $0x34] sm:$0xf0]  ;;  %v2906_v46 = vld [vmem:[#allocation7 + $0x1c] sm:$0xf]  ;;  %v3368_v50 = vpack.c.bf16 %v164_v33, %v163_v32 }
  0x2b   :  { %v320_v40 = vsel %vm306_vm0, %v290_v28, 0  ;;  %v323_v41 = vsel %vm306_vm0, %v291_v29, 0  ;;  %v292_v42 = vpack.c.b16 %v276_v30, %v276_v30  ;;  %v293_v43 = vpack.c.b16 %v277_v31, %v277_v31  ;;  %v2051_v47 = vld [vmem:[#allocation7 + $0x38] sm:$0xf0]  ;;  %v2289_v48 = vld [vmem:[#allocation6 + $0x1c0] sm:$0xf] }
  0x2c   :  { %v2899_v49 = vld [vmem:[#allocation6 + $0x1dc] sm:$0x70]  ;;  %v2895_v51 = vld [vmem:[#allocation6 + $0x1c4] sm:$0xf]  ;;  %v2297_v53 = vld [vmem:[#allocation6 + $0x1c8] sm:$0xf]  ;;  %v2042_v62 = vor.u32 %v2909_v37, %v2041_v36  ;;  %v2046_v63 = vor.u32 %v2905_v38, %v2043_v39  ;;  %v2050_v1 = vor.u32 %v2910_v45, %v2049_v44  ;;  %v2054_v2 = vor.u32 %v2906_v46, %v2051_v47 }
  0x2d   :  { %v2291_v52 = vld [vmem:[#allocation6 + $0x1e0] sm:$0x70]  ;;  %338 = vmatpush.bf16.msra.mxu0 %v2026_v17  ;;  %352 = vmatpush.bf16.msra.mxu1 %v2030_v18  ;;  %v326_v54 = vsel %vm306_vm0, %v292_v42, 0  ;;  %v329_v55 = vsel %vm306_vm0, %v293_v43, 0  ;;  %v2290_v56 = vor.u32 %v2899_v49, %v2289_v48  ;;  %v2900_v58 = vld [vmem:[#allocation6 + $0x1e4] sm:$0x70] }
  0x2e   :  { %v2294_v57 = vor.u32 %v2895_v51, %v2291_v52  ;;  %v2896_v59 = vld [vmem:[#allocation6 + $0x1cc] sm:$0xf]  ;;  %366 = vmatpush.bf16.msra.mxu2 %v2034_v34  ;;  %380 = vmatpush.bf16.msra.mxu3 %v2038_v35  ;;  %vm302_vm1 = vcmask 162816   ;;  %vm759_vm2 = vcmask 1046528   ;;  %v2298_v60 = vor.u32 %v2900_v58, %v2297_v53  ;;  %v2257_v3 = vld [vmem:[#allocation6 + $0x180] sm:$0xf] }
  0x2f   :  { %v2299_v61 = vld [vmem:[#allocation6 + $0x1e8] sm:$0x70]  ;;  %v761_v4 = vsel %vm759_vm2, %v2290_v56, 0  ;;  %v2891_v6 = vld [vmem:[#allocation6 + $0x19c] sm:$0xf0]  ;;  %vm755_vm3 = vcmask 1031168  }
  0x30   :  { %v2302_v0 = vor.u32 %v2896_v59, %v2299_v61  ;;  %v764_v5 = vsel %vm759_vm2, %v2294_v57, 0  ;;  %v2887_v7 = vld [vmem:[#allocation6 + $0x184] sm:$0xf]  ;;  %2055 = vmatmul.msk.bf16.vlgmr.msra.gmra.mxu0 %vm302_vm1, %v3368_v50  ;;  %2056 = vmatmul.msk.bf16.vlgmr.msra.gmra.mxu1 %vm302_vm1, %v3368_v50  ;;  %v767_v8 = vsel %vm759_vm2, %v2298_v60, 0  ;;  %v2265_v11 = vld [vmem:[#allocation6 + $0x188] sm:$0xf]  ;;  %v2258_v15 = vor.u32 %v2891_v6, %v2257_v3 }
  0x31   :  { %393 = vmatpush.bf16.msrb.mxu0 %v320_v40  ;;  %407 = vmatpush.bf16.msrb.mxu1 %v323_v41  ;;  %v2259_v10 = vld [vmem:[#allocation6 + $0x1a0] sm:$0xf0]  ;;  %v2892_v12 = vld [vmem:[#allocation6 + $0x1a4] sm:$0xf0]  ;;  %v2888_v13 = vld [vmem:[#allocation6 + $0x18c] sm:$0xf] }
  0x32   :  { %421 = vmatpush.bf16.msrb.mxu2 %v326_v54  ;;  %435 = vmatpush.bf16.msrb.mxu3 %v329_v55  ;;  %v770_v9 = vsel %vm759_vm2, %v2302_v0, 0  ;;  %v2267_v14 = vld [vmem:[#allocation6 + $0x1a8] sm:$0xf0]  ;;  %v2262_v16 = vor.u32 %v2887_v7, %v2259_v10  ;;  %v2225_v17 = vld [vmem:[#allocation6 + $0x140] sm:$0xf]  ;;  %v2266_v19 = vor.u32 %v2892_v12, %v2265_v11  ;;  %vm2011_vm5 = vcmask 15360  }
  0x33   :  { %2057 = vmatmul.msk.bf16.vlgmr.msra.gmra.mxu2 %vm302_vm1, %v3368_v50  ;;  %2058 = vmatmul.msk.bf16.vlgmr.msra.gmra.mxu3 %vm302_vm1, %v3368_v50  ;;  %v2883_v18 = vld [vmem:[#allocation6 + $0x15c] sm:$0xf0]  ;;  %v2270_v20 = vor.u32 %v2888_v13, %v2267_v14  ;;  %v2879_v21 = vld [vmem:[#allocation6 + $0x144] sm:$0xf]  ;;  %v2233_v23 = vld [vmem:[#allocation6 + $0x148] sm:$0xf] }
  0x34   :  { %v2227_v22 = vld [vmem:[#allocation6 + $0x160] sm:$0xf0]  ;;  %v2884_v24 = vld [vmem:[#allocation6 + $0x164] sm:$0xf0]  ;;  %v2880_v25 = vld [vmem:[#allocation6 + $0x14c] sm:$0xf]  ;;  %v2226_v27 = vor.u32 %v2883_v18, %v2225_v17 }
  0x35   :  { %394 = vmatpush.bf16.msrb.mxu0 %v2042_v62  ;;  %408 = vmatpush.bf16.msrb.mxu1 %v2046_v63  ;;  %v2235_v26 = vld [vmem:[#allocation6 + $0x168] sm:$0xf0]  ;;  %v2230_v28 = vor.u32 %v2879_v21, %v2227_v22  ;;  %v2193_v29 = vld [vmem:[#allocation6 + $0x100] sm:$0xf]  ;;  %v2234_v31 = vor.u32 %v2884_v24, %v2233_v23  ;;  %v2871_v33 = vld [vmem:[#allocation6 + $0x104] sm:$0xf] }
  0x36   :  { %422 = vmatpush.bf16.msrb.mxu2 %v2050_v1  ;;  %436 = vmatpush.bf16.msrb.mxu3 %v2054_v2  ;;  %v2875_v30 = vld [vmem:[#allocation6 + $0x11c] sm:$0xf0]  ;;  %v2238_v32 = vor.u32 %v2880_v25, %v2235_v26  ;;  %v2195_v34 = vld [vmem:[#allocation6 + $0x120] sm:$0xf0]  ;;  %v2201_v35 = vld [vmem:[#allocation6 + $0x108] sm:$0xf] }
  0x37   :  { %v2876_v36 = vld [vmem:[#allocation6 + $0x124] sm:$0xf0]  ;;  %v2872_v37 = vld [vmem:[#allocation6 + $0x10c] sm:$0xf]  ;;  %v2194_v39 = vor.u32 %v2875_v30, %v2193_v29  ;;  %v2198_v40 = vor.u32 %v2871_v33, %v2195_v34  ;;  %v2161_v41 = vld [vmem:[#allocation6 + $0xc0] sm:$0xf] }
  0x38   :  { %v2203_v38 = vld [vmem:[#allocation6 + $0x128] sm:$0xf0]  ;;  %v2867_v42 = vld [vmem:[#allocation6 + $0xdc] sm:$0xf0]  ;;  %v2202_v43 = vor.u32 %v2876_v36, %v2201_v35  ;;  %v2863_v45 = vld [vmem:[#allocation6 + $0xc4] sm:$0xf] }
  0x39   :  { %784 = vmatpush.bf16.msra.mxu0 %v761_v4  ;;  %798 = vmatpush.bf16.msra.mxu1 %v764_v5  ;;  %v2206_v44 = vor.u32 %v2872_v37, %v2203_v38  ;;  %v2163_v46 = vld [vmem:[#allocation6 + $0xe0] sm:$0xf0]  ;;  %v2169_v47 = vld [vmem:[#allocation6 + $0xc8] sm:$0xf]  ;;  %v2864_v49 = vld [vmem:[#allocation6 + $0xcc] sm:$0xf]  ;;  %v2162_v52 = vor.u32 %v2867_v42, %v2161_v41 }
  0x3a   :  { %812 = vmatpush.bf16.msra.mxu2 %v767_v8  ;;  %826 = vmatpush.bf16.msra.mxu3 %v770_v9  ;;  %v2868_v48 = vld [vmem:[#allocation6 + $0xe4] sm:$0xf0]  ;;  %v2171_v51 = vld [vmem:[#allocation6 + $0xe8] sm:$0xf0]  ;;  %v2166_v53 = vor.u32 %v2863_v45, %v2163_v46  ;;  %v2129_v54 = vld [vmem:[#allocation6 + $0x80] sm:$0xf] }
  0x3b   :  { %v2859_v55 = vld [vmem:[#allocation6 + $0x9c] sm:$0xf0]  ;;  %v2170_v56 = vor.u32 %v2868_v48, %v2169_v47  ;;  %v2174_v57 = vor.u32 %v2864_v49, %v2171_v51  ;;  %v2855_v58 = vld [vmem:[#allocation6 + $0x84] sm:$0xf]  ;;  %v2137_v60 = vld [vmem:[#allocation6 + $0x88] sm:$0xf] }
  0x3c   :  { %v2131_v59 = vld [vmem:[#allocation6 + $0xa0] sm:$0xf0]  ;;  %v2860_v61 = vld [vmem:[#allocation6 + $0xa4] sm:$0xf0]  ;;  %v2856_v62 = vld [vmem:[#allocation6 + $0x8c] sm:$0xf]  ;;  %v2130_v1 = vor.u32 %v2859_v55, %v2129_v54 }
  0x3d   :  { %785 = vmatpush.bf16.msra.mxu0 %v2258_v15  ;;  %799 = vmatpush.bf16.msra.mxu1 %v2262_v16  ;;  %v2139_v63 = vld [vmem:[#allocation6 + $0xa8] sm:$0xf0]  ;;  %v2097_v0 = vld [vmem:[#allocation6 + $0x40] sm:$0xf]  ;;  %v2134_v2 = vor.u32 %v2855_v58, %v2131_v59  ;;  %v2847_v4 = vld [vmem:[#allocation6 + $0x44] sm:$0xf]  ;;  %v2138_v6 = vor.u32 %v2860_v61, %v2137_v60 }
  0x3e   :  { %813 = vmatpush.bf16.msra.mxu2 %v2266_v19  ;;  %827 = vmatpush.bf16.msra.mxu3 %v2270_v20  ;;  %v2851_v3 = vld [vmem:[#allocation6 + $0x5c] sm:$0xf0]  ;;  %v2099_v5 = vld [vmem:[#allocation6 + $0x60] sm:$0xf0]  ;;  %v2142_v7 = vor.u32 %v2856_v62, %v2139_v63  ;;  %v2105_v8 = vld [vmem:[#allocation6 + $0x48] sm:$0xf] }
  0x3f   :  { %v2852_v9 = vld [vmem:[#allocation6 + $0x64] sm:$0xf0]  ;;  %v2848_v10 = vld [vmem:[#allocation6 + $0x4c] sm:$0xf]  ;;  %v2305_v12 = vld [vmem:[#allocation6 + $0x1d0] sm:$0xf]  ;;  %v2098_v18 = vor.u32 %v2851_v3, %v2097_v0  ;;  %v2102_v19 = vor.u32 %v2847_v4, %v2099_v5 }
  0x40   :  { %2059 = vmatmul.msk.bf16.vlgmr.msrb.gmra.mxu0 %vm302_vm1, %v3368_v50  ;;  %2060 = vmatmul.msk.bf16.vlgmr.msrb.gmra.mxu1 %vm302_vm1, %v3368_v50  ;;  %v2107_v11 = vld [vmem:[#allocation6 + $0x68] sm:$0xf0]  ;;  %v2901_v13 = vld [vmem:[#allocation6 + $0x1ec] sm:$0x70]  ;;  %v2065_v14 = vld [vmem:[#allocation6] sm:$0xf]  ;;  %v2106_v23 = vor.u32 %v2852_v9, %v2105_v8 }
  0x41   :  { %786 = vmatpush.bf16.msra.mxu0 %v2226_v27  ;;  %800 = vmatpush.bf16.msra.mxu1 %v2230_v28  ;;  %v2897_v15 = vld [vmem:[#allocation6 + $0x1d4] sm:$0xf]  ;;  %v2313_v17 = vld [vmem:[#allocation6 + $0x1d8] sm:$0xf]  ;;  %v2898_v21 = vld [vmem:[#allocation6 + $0x1dc] sm:$0xf]  ;;  %v2110_v24 = vor.u32 %v2848_v10, %v2107_v11 }
  0x42   :  { %814 = vmatpush.bf16.msra.mxu2 %v2234_v31  ;;  %828 = vmatpush.bf16.msra.mxu3 %v2238_v32  ;;  %v2307_v16 = vld [vmem:[#allocation6 + $0x1f0] sm:$0x70]  ;;  %v2902_v20 = vld [vmem:[#allocation6 + $0x1f4] sm:$0x70]  ;;  %v2315_v22 = vld [vmem:[#allocation6 + $0x1f8] sm:$0x70]  ;;  %v2306_v31 = vor.u32 %v2901_v13, %v2305_v12 }
  0x43   :  { %2061 = vmatmul.msk.bf16.vlgmr.msrb.gmra.mxu2 %vm302_vm1, %v3368_v50  ;;  %2062 = vmatmul.msk.bf16.vlgmr.msrb.gmra.mxu3 %vm302_vm1, %v3368_v50  ;;  %v2843_v50 = vld [vmem:[#allocation6 + $0x1c] sm:$0xf0]  ;;  %v2839_v25 = vld [vmem:[#allocation6 + $0x4] sm:$0xf]  ;;  %v2073_v27 = vld [vmem:[#allocation6 + $0x8] sm:$0xf]  ;;  %v2310_v32 = vor.u32 %v2897_v15, %v2307_v16  ;;  %v2314_v33 = vor.u32 %v2902_v20, %v2313_v17  ;;  %v2318_v34 = vor.u32 %v2898_v21, %v2315_v22 }
  0x44   :  { %v2067_v26 = vld [vmem:[#allocation6 + $0x20] sm:$0xf0]  ;;  %v2844_v28 = vld [vmem:[#allocation6 + $0x24] sm:$0xf0]  ;;  %v2840_v29 = vld [vmem:[#allocation6 + $0xc] sm:$0xf]  ;;  %v2066_v35 = vor.u32 %v2843_v50, %v2065_v14 }
  0x45   :  { %787 = vmatpush.bf16.msra.mxu0 %v2194_v39  ;;  %801 = vmatpush.bf16.msra.mxu1 %v2198_v40  ;;  %v2075_v30 = vld [vmem:[#allocation6 + $0x28] sm:$0xf0]  ;;  %v2070_v36 = vor.u32 %v2839_v25, %v2067_v26  ;;  %v2074_v37 = vor.u32 %v2844_v28, %v2073_v27  ;;  %v160_v39 = vld [vmem:[#allocation2] sm:$0xff]  ;;  %v2273_v41 = vld [vmem:[#allocation6 + $0x190] sm:$0xf]  ;;  %v773_v42 = vsel %vm759_vm2, %v2306_v31, 0 }
  0x46   :  { %815 = vmatpush.bf16.msra.mxu2 %v2202_v43  ;;  %829 = vmatpush.bf16.msra.mxu3 %v2206_v44  ;;  %v2078_v38 = vor.u32 %v2840_v29, %v2075_v30  ;;  %v161_v40 = vld [vmem:[#allocation2 + $0x8] sm:$0xff]  ;;  %v776_v43 = vsel %vm759_vm2, %v2310_v32, 0  ;;  %v2893_v44 = vld [vmem:[#allocation6 + $0x1ac] sm:$0xf0]  ;;  %v2889_v45 = vld [vmem:[#allocation6 + $0x194] sm:$0xf] }
  0x47   :  { %v779_v46 = vsel %vm759_vm2, %v2314_v33, 0  ;;  %v782_v47 = vsel %vm759_vm2, %v2318_v34, 0  ;;  %v2275_v48 = vld [vmem:[#allocation6 + $0x1b0] sm:$0xf0]  ;;  %v2281_v49 = vld [vmem:[#allocation6 + $0x198] sm:$0xf]  ;;  %v3396_v51 = vpack.c.bf16 %v161_v40, %v160_v39  ;;  %v2274_v55 = vor.u32 %v2893_v44, %v2273_v41 }
  0x48   :  { %v2283_v54 = vld [vmem:[#allocation6 + $0x1b8] sm:$0xf0]  ;;  %v2885_v58 = vld [vmem:[#allocation6 + $0x16c] sm:$0xf0]  ;;  %v2881_v61 = vld [vmem:[#allocation6 + $0x154] sm:$0xf] }
  0x49   :  { %788 = vmatpush.bf16.msra.mxu0 %v2162_v52  ;;  %802 = vmatpush.bf16.msra.mxu1 %v2166_v53  ;;  %v2894_v52 = vld [vmem:[#allocation6 + $0x1b4] sm:$0xf0]  ;;  %v2890_v53 = vld [vmem:[#allocation6 + $0x19c] sm:$0xf]  ;;  %v2243_v62 = vld [vmem:[#allocation6 + $0x170] sm:$0xf0] }
  0x4a   :  { %816 = vmatpush.bf16.msra.mxu2 %v2170_v56  ;;  %830 = vmatpush.bf16.msra.mxu3 %v2174_v57  ;;  %v2278_v56 = vor.u32 %v2889_v45, %v2275_v48  ;;  %v2241_v57 = vld [vmem:[#allocation6 + $0x150] sm:$0xf]  ;;  %v2282_v59 = vor.u32 %v2894_v52, %v2281_v49  ;;  %v2286_v60 = vor.u32 %v2890_v53, %v2283_v54  ;;  %v2249_v63 = vld [vmem:[#allocation6 + $0x158] sm:$0xf]  ;;  %v2873_v9 = vld [vmem:[#allocation6 + $0x114] sm:$0xf] }
  0x4b   :  { %v2886_v0 = vld [vmem:[#allocation6 + $0x174] sm:$0xf0]  ;;  %v2242_v3 = vor.u32 %v2885_v58, %v2241_v57  ;;  %v2246_v4 = vor.u32 %v2881_v61, %v2243_v62  ;;  %v2209_v5 = vld [vmem:[#allocation6 + $0x110] sm:$0xf]  ;;  %v2211_v10 = vld [vmem:[#allocation6 + $0x130] sm:$0xf0] }
  0x4c   :  { %v2217_v11 = vld [vmem:[#allocation6 + $0x118] sm:$0xf]  ;;  %v2874_v13 = vld [vmem:[#allocation6 + $0x11c] sm:$0xf]  ;;  %v2214_v15 = vor.u32 %v2873_v9, %v2211_v10  ;;  %v2177_v16 = vld [vmem:[#allocation6 + $0xd0] sm:$0xf] }
  0x4d   :  { %789 = vmatpush.bf16.msra.mxu0 %v2130_v1  ;;  %803 = vmatpush.bf16.msra.mxu1 %v2134_v2  ;;  %v2882_v1 = vld [vmem:[#allocation6 + $0x15c] sm:$0xf]  ;;  %v2878_v12 = vld [vmem:[#allocation6 + $0x134] sm:$0xf0]  ;;  %v2869_v17 = vld [vmem:[#allocation6 + $0xec] sm:$0xf0] }
  0x4e   :  { %817 = vmatpush.bf16.msra.mxu2 %v2138_v6  ;;  %831 = vmatpush.bf16.msra.mxu3 %v2142_v7  ;;  %v2251_v2 = vld [vmem:[#allocation6 + $0x178] sm:$0xf0]  ;;  %v2877_v6 = vld [vmem:[#allocation6 + $0x12c] sm:$0xf0]  ;;  %v2250_v7 = vor.u32 %v2886_v0, %v2249_v63  ;;  %v2865_v20 = vld [vmem:[#allocation6 + $0xd4] sm:$0xf]  ;;  %v2178_v26 = vor.u32 %v2869_v17, %v2177_v16 }
  0x4f   :  { %v2254_v8 = vor.u32 %v2882_v1, %v2251_v2  ;;  %v2219_v14 = vld [vmem:[#allocation6 + $0x138] sm:$0xf0]  ;;  %v2210_v50 = vor.u32 %v2877_v6, %v2209_v5  ;;  %v2179_v21 = vld [vmem:[#allocation6 + $0xf0] sm:$0xf0]  ;;  %v2185_v22 = vld [vmem:[#allocation6 + $0xd8] sm:$0xf] }
  0x50   :  { %v2187_v25 = vld [vmem:[#allocation6 + $0xf8] sm:$0xf0]  ;;  %v2182_v27 = vor.u32 %v2865_v20, %v2179_v21  ;;  %v2145_v28 = vld [vmem:[#allocation6 + $0x90] sm:$0xf]  ;;  %v2857_v32 = vld [vmem:[#allocation6 + $0x94] sm:$0xf] }
  0x51   :  { %790 = vmatpush.bf16.msra.mxu0 %v2098_v18  ;;  %804 = vmatpush.bf16.msra.mxu1 %v2102_v19  ;;  %v2218_v18 = vor.u32 %v2878_v12, %v2217_v11  ;;  %v2222_v19 = vor.u32 %v2874_v13, %v2219_v14  ;;  %v2861_v29 = vld [vmem:[#allocation6 + $0xac] sm:$0xf0]  ;;  %v2147_v33 = vld [vmem:[#allocation6 + $0xb0] sm:$0xf0]  ;;  %v2153_v34 = vld [vmem:[#allocation6 + $0x98] sm:$0xf] }
  0x52   :  { %818 = vmatpush.bf16.msra.mxu2 %v2106_v23  ;;  %832 = vmatpush.bf16.msra.mxu3 %v2110_v24  ;;  %v2870_v23 = vld [vmem:[#allocation6 + $0xf4] sm:$0xf0]  ;;  %v2866_v24 = vld [vmem:[#allocation6 + $0xdc] sm:$0xf]  ;;  %v2150_v39 = vor.u32 %v2857_v32, %v2147_v33  ;;  %v2113_v40 = vld [vmem:[#allocation6 + $0x50] sm:$0xf] }
  0x53   :  { %v2186_v30 = vor.u32 %v2870_v23, %v2185_v22  ;;  %v2190_v31 = vor.u32 %v2866_v24, %v2187_v25  ;;  %v2853_v41 = vld [vmem:[#allocation6 + $0x6c] sm:$0xf0]  ;;  %v2849_v44 = vld [vmem:[#allocation6 + $0x54] sm:$0xf]  ;;  %v2850_v48 = vld [vmem:[#allocation6 + $0x5c] sm:$0xf] }
  0x54   :  { %v2115_v45 = vld [vmem:[#allocation6 + $0x70] sm:$0xf0]  ;;  %v2123_v49 = vld [vmem:[#allocation6 + $0x78] sm:$0xf0]  ;;  %v2114_v52 = vor.u32 %v2853_v41, %v2113_v40  ;;  %v2081_v54 = vld [vmem:[#allocation6 + $0x10] sm:$0xf] }
  0x55   :  { %791 = vmatpush.bf16.msra.mxu0 %v2066_v35  ;;  %805 = vmatpush.bf16.msra.mxu1 %v2070_v36  ;;  %v2862_v35 = vld [vmem:[#allocation6 + $0xb4] sm:$0xf0]  ;;  %v2858_v36 = vld [vmem:[#allocation6 + $0x9c] sm:$0xf]  ;;  %v2118_v53 = vor.u32 %v2849_v44, %v2115_v45  ;;  %v2126_v58 = vor.u32 %v2850_v48, %v2123_v49  ;;  %v2926_v1 = vld [vmem:[#allocation10 + $0x74] sm:$0xf0] }
  0x56   :  { %819 = vmatpush.bf16.msra.mxu2 %v2074_v37  ;;  %833 = vmatpush.bf16.msra.mxu3 %v2078_v38  ;;  %v2155_v37 = vld [vmem:[#allocation6 + $0xb8] sm:$0xf0]  ;;  %v2146_v38 = vor.u32 %v2861_v29, %v2145_v28  ;;  %v2846_v61 = vld [vmem:[#allocation6 + $0x34] sm:$0xf0]  ;;  %v2958_v12 = vld [vmem:[#allocation10 + $0x174] sm:$0xf0] }
  0x57   :  { %v2842_v62 = vld [vmem:[#allocation6 + $0x1c] sm:$0xf]  ;;  %v2385_v0 = vld [vmem:[#allocation10 + $0x70] sm:$0xf]  ;;  %v2974_v14 = vld [vmem:[#allocation10 + $0x1f4] sm:$0xf0] }
  0x58   :  { %2319 = vmatmul.msk.bf16.vlgmr.msra.gmra.mxu0 %vm755_vm3, %v3396_v51  ;;  %2320 = vmatmul.msk.bf16.vlgmr.msra.gmra.mxu1 %vm755_vm3, %v3396_v51  ;;  %v2091_v63 = vld [vmem:[#allocation6 + $0x38] sm:$0xf0]  ;;  %v2449_v2 = vld [vmem:[#allocation10 + $0xf0] sm:$0xf]  ;;  %v2386_v10 = vor.u32 %v2926_v1, %v2385_v0  ;;  %v2940_v16 = vld [vmem:[#allocation10 + $0xe4] sm:$0xf0] }
  0x59   :  { %840 = vmatpush.bf16.msrb.mxu0 %v773_v42  ;;  %854 = vmatpush.bf16.msrb.mxu1 %v776_v43  ;;  %v2154_v42 = vor.u32 %v2862_v35, %v2153_v34  ;;  %v2158_v43 = vor.u32 %v2858_v36, %v2155_v37  ;;  %v2513_v9 = vld [vmem:[#allocation10 + $0x170] sm:$0xf]  ;;  %v2922_v22 = vld [vmem:[#allocation10 + $0x54] sm:$0xf0]  ;;  %v2956_v28 = vld [vmem:[#allocation10 + $0x164] sm:$0xf0] }
  0x5a   :  { %868 = vmatpush.bf16.msrb.mxu2 %v779_v46  ;;  %882 = vmatpush.bf16.msrb.mxu3 %v782_v47  ;;  %v2121_v46 = vld [vmem:[#allocation6 + $0x58] sm:$0xf]  ;;  %v2514_v17 = vor.u32 %v2958_v12, %v2513_v9  ;;  %v2938_v24 = vld [vmem:[#allocation10 + $0xd4] sm:$0xf0]  ;;  %v2569_v29 = vld [vmem:[#allocation10 + $0x1e0] sm:$0xf] }
  0x5b   :  { %2321 = vmatmul.msk.bf16.vlgmr.msra.gmra.mxu2 %vm755_vm3, %v3396_v51  ;;  %2322 = vmatmul.msk.bf16.vlgmr.msra.gmra.mxu3 %vm755_vm3, %v3396_v51  ;;  %v2854_v47 = vld [vmem:[#allocation6 + $0x74] sm:$0xf0]  ;;  %v2361_v32 = vld [vmem:[#allocation10 + $0x40] sm:$0xf]  ;;  %v2920_v33 = vld [vmem:[#allocation10 + $0x44] sm:$0xf0] }
  0x5c   :  { %v2122_v57 = vor.u32 %v2854_v47, %v2121_v46  ;;  %v2577_v13 = vld [vmem:[#allocation10 + $0x1f0] sm:$0xf]  ;;  %v2362_v35 = vor.u32 %v2920_v33, %v2361_v32  ;;  %v2425_v36 = vld [vmem:[#allocation10 + $0xc0] sm:$0xf]  ;;  %v2936_v37 = vld [vmem:[#allocation10 + $0xc4] sm:$0xf0] }
  0x5d   :  { %841 = vmatpush.bf16.msrb.mxu0 %v2274_v55  ;;  %855 = vmatpush.bf16.msrb.mxu1 %v2278_v56  ;;  %v2845_v55 = vld [vmem:[#allocation6 + $0x2c] sm:$0xf0]  ;;  %v2841_v56 = vld [vmem:[#allocation6 + $0x14] sm:$0xf]  ;;  %v2369_v21 = vld [vmem:[#allocation10 + $0x50] sm:$0xf] }
  0x5e   :  { %869 = vmatpush.bf16.msrb.mxu2 %v2282_v59  ;;  %883 = vmatpush.bf16.msrb.mxu3 %v2286_v60  ;;  %v2083_v59 = vld [vmem:[#allocation6 + $0x30] sm:$0xf0]  ;;  %v2089_v60 = vld [vmem:[#allocation6 + $0x18] sm:$0xf]  ;;  %v2370_v25 = vor.u32 %v2922_v22, %v2369_v21  ;;  %v2918_v44 = vld [vmem:[#allocation10 + $0x34] sm:$0xf0] }
  0x5f   :  { %v2086_v5 = vor.u32 %v2841_v56, %v2083_v59  ;;  %v2090_v6 = vor.u32 %v2846_v61, %v2089_v60  ;;  %v2433_v23 = vld [vmem:[#allocation10 + $0xd0] sm:$0xf]  ;;  %v2934_v48 = vld [vmem:[#allocation10 + $0xb4] sm:$0xf0]  ;;  %v2968_v56 = vld [vmem:[#allocation10 + $0x1c4] sm:$0xf0] }
  0x60   :  { %v2561_v40 = vld [vmem:[#allocation10 + $0x1d0] sm:$0xf]  ;;  %v2409_v61 = vld [vmem:[#allocation10 + $0xa0] sm:$0xf]  ;;  %v2950_v1 = vld [vmem:[#allocation10 + $0x134] sm:$0xf0] }
  0x61   :  { %842 = vmatpush.bf16.msrb.mxu0 %v2242_v3  ;;  %856 = vmatpush.bf16.msrb.mxu1 %v2246_v4  ;;  %v2942_v3 = vld [vmem:[#allocation10 + $0xf4] sm:$0xf0]  ;;  %v2082_v4 = vor.u32 %v2845_v55, %v2081_v54  ;;  %v2417_v47 = vld [vmem:[#allocation10 + $0xb0] sm:$0xf]  ;;  %v2553_v54 = vld [vmem:[#allocation10 + $0x1c0] sm:$0xf] }
  0x62   :  { %870 = vmatpush.bf16.msrb.mxu2 %v2250_v7  ;;  %884 = vmatpush.bf16.msrb.mxu3 %v2254_v8  ;;  %v2094_v7 = vor.u32 %v2842_v62, %v2091_v63  ;;  %v2377_v8 = vld [vmem:[#allocation10 + $0x60] sm:$0xf]  ;;  %v2450_v11 = vor.u32 %v2942_v3, %v2449_v2  ;;  %v2418_v49 = vor.u32 %v2934_v48, %v2417_v47  ;;  %v2932_v62 = vld [vmem:[#allocation10 + $0xa4] sm:$0xf0]  ;;  %v2481_v0 = vld [vmem:[#allocation10 + $0x130] sm:$0xf] }
  0x63   :  { %v2554_v59 = vor.u32 %v2968_v56, %v2553_v54  ;;  %v2410_v63 = vor.u32 %v2932_v62, %v2409_v61  ;;  %v2545_v2 = vld [vmem:[#allocation10 + $0x1b0] sm:$0xf]  ;;  %v2482_v3 = vor.u32 %v2950_v1, %v2481_v0  ;;  %v2473_v12 = vld [vmem:[#allocation10 + $0x120] sm:$0xf]  ;;  %v2928_v21 = vld [vmem:[#allocation10 + $0x84] sm:$0xf0] }
  0x64   :  { %v2401_v9 = vld [vmem:[#allocation10 + $0x90] sm:$0xf]  ;;  %v2962_v33 = vld [vmem:[#allocation10 + $0x194] sm:$0xf0]  ;;  %v2515_v47 = vld [vmem:[#allocation10 + $0x178] sm:$0xf0] }
  0x65   :  { %843 = vmatpush.bf16.msrb.mxu0 %v2210_v50  ;;  %857 = vmatpush.bf16.msrb.mxu1 %v2214_v15  ;;  %v2924_v50 = vld [vmem:[#allocation10 + $0x64] sm:$0xf0]  ;;  %v2441_v15 = vld [vmem:[#allocation10 + $0xe0] sm:$0xf]  ;;  %v2529_v32 = vld [vmem:[#allocation10 + $0x190] sm:$0xf] }
  0x66   :  { %871 = vmatpush.bf16.msrb.mxu2 %v2218_v18  ;;  %885 = vmatpush.bf16.msrb.mxu3 %v2222_v19  ;;  %v2578_v18 = vor.u32 %v2974_v14, %v2577_v13  ;;  %v2378_v19 = vor.u32 %v2924_v50, %v2377_v8  ;;  %v2442_v20 = vor.u32 %v2940_v16, %v2441_v15  ;;  %v2948_v13 = vld [vmem:[#allocation10 + $0x124] sm:$0xf0]  ;;  %v2537_v14 = vld [vmem:[#allocation10 + $0x1a0] sm:$0xf]  ;;  %v2973_v48 = vld [vmem:[#allocation10 + $0x1f4] sm:$0xf] }
  0x67   :  { %v2474_v50 = vor.u32 %v2948_v13, %v2473_v12  ;;  %v2964_v15 = vld [vmem:[#allocation10 + $0x1a4] sm:$0xf0]  ;;  %v2329_v16 = vld [vmem:[#allocation10] sm:$0xf]  ;;  %v2921_v54 = vld [vmem:[#allocation10 + $0x54] sm:$0xf] }
  0x68   :  { %v2937_v56 = vld [vmem:[#allocation10 + $0xd4] sm:$0xf]  ;;  %v2507_v61 = vld [vmem:[#allocation10 + $0x168] sm:$0xf0]  ;;  %v2971_v62 = vld [vmem:[#allocation10 + $0x1e4] sm:$0xf] }
  0x69   :  { %844 = vmatpush.bf16.msrb.mxu0 %v2178_v26  ;;  %858 = vmatpush.bf16.msrb.mxu1 %v2182_v27  ;;  %v2434_v26 = vor.u32 %v2938_v24, %v2433_v23  ;;  %v2505_v27 = vld [vmem:[#allocation10 + $0x160] sm:$0xf]  ;;  %v2925_v23 = vld [vmem:[#allocation10 + $0x74] sm:$0xf]  ;;  %v2387_v24 = vld [vmem:[#allocation10 + $0x78] sm:$0xf0] }
  0x6a   :  { %872 = vmatpush.bf16.msrb.mxu2 %v2186_v30  ;;  %886 = vmatpush.bf16.msrb.mxu3 %v2190_v31  ;;  %v2506_v30 = vor.u32 %v2956_v28, %v2505_v27  ;;  %v2972_v31 = vld [vmem:[#allocation10 + $0x1e4] sm:$0xf0]  ;;  %v2451_v27 = vld [vmem:[#allocation10 + $0xf8] sm:$0xf0]  ;;  %v2465_v28 = vld [vmem:[#allocation10 + $0x110] sm:$0xf] }
  0x6b   :  { %v2570_v34 = vor.u32 %v2972_v31, %v2569_v29  ;;  %v2946_v29 = vld [vmem:[#allocation10 + $0x114] sm:$0xf0]  ;;  %v2969_v12 = vld [vmem:[#allocation10 + $0x1d4] sm:$0xf] }
  0x6c   :  { %v2466_v31 = vor.u32 %v2946_v29, %v2465_v28  ;;  %v2555_v29 = vld [vmem:[#allocation10 + $0x1c8] sm:$0xf0] }
  0x6d   :  { %845 = vmatpush.bf16.msrb.mxu0 %v2146_v38  ;;  %859 = vmatpush.bf16.msrb.mxu1 %v2150_v39  ;;  %v2497_v38 = vld [vmem:[#allocation10 + $0x150] sm:$0xf]  ;;  %v2954_v39 = vld [vmem:[#allocation10 + $0x154] sm:$0xf0] }
  0x6e   :  { %873 = vmatpush.bf16.msrb.mxu2 %v2154_v42  ;;  %887 = vmatpush.bf16.msrb.mxu3 %v2158_v43  ;;  %v2498_v41 = vor.u32 %v2954_v39, %v2497_v38  ;;  %v2970_v42 = vld [vmem:[#allocation10 + $0x1d4] sm:$0xf0]  ;;  %v2353_v43 = vld [vmem:[#allocation10 + $0x30] sm:$0xf]  ;;  %v2443_v38 = vld [vmem:[#allocation10 + $0xe8] sm:$0xf0] }
  0x6f   :  { %v2562_v45 = vor.u32 %v2970_v42, %v2561_v40  ;;  %v2354_v46 = vor.u32 %v2918_v44, %v2353_v43  ;;  %v2457_v39 = vld [vmem:[#allocation10 + $0x100] sm:$0xf]  ;;  %v2944_v40 = vld [vmem:[#allocation10 + $0x104] sm:$0xf0] }
  0x70   :  { %v2458_v42 = vor.u32 %v2944_v40, %v2457_v39  ;;  %v2521_v43 = vld [vmem:[#allocation10 + $0x180] sm:$0xf]  ;;  %v2960_v44 = vld [vmem:[#allocation10 + $0x184] sm:$0xf0]  ;;  %v2965_v39 = vld [vmem:[#allocation10 + $0x1b4] sm:$0xf] }
  0x71   :  { %846 = vmatpush.bf16.msrb.mxu0 %v2114_v52  ;;  %860 = vmatpush.bf16.msrb.mxu1 %v2118_v53  ;;  %v2489_v52 = vld [vmem:[#allocation10 + $0x140] sm:$0xf]  ;;  %v2952_v53 = vld [vmem:[#allocation10 + $0x144] sm:$0xf0]  ;;  %v2547_v40 = vld [vmem:[#allocation10 + $0x1b8] sm:$0xf0] }
  0x72   :  { %874 = vmatpush.bf16.msrb.mxu2 %v2122_v57  ;;  %888 = vmatpush.bf16.msrb.mxu3 %v2126_v58  ;;  %v2490_v55 = vor.u32 %v2952_v53, %v2489_v52  ;;  %v2345_v57 = vld [vmem:[#allocation10 + $0x20] sm:$0xf]  ;;  %v2916_v58 = vld [vmem:[#allocation10 + $0x24] sm:$0xf0] }
  0x73   :  { %v2346_v60 = vor.u32 %v2916_v58, %v2345_v57  ;;  %v2435_v58 = vld [vmem:[#allocation10 + $0xd8] sm:$0xf0] }
  0x75   :  { %847 = vmatpush.bf16.msrb.mxu0 %v2082_v4  ;;  %861 = vmatpush.bf16.msrb.mxu1 %v2086_v5  ;;  %v2966_v4 = vld [vmem:[#allocation10 + $0x1b4] sm:$0xf0]  ;;  %v2337_v5 = vld [vmem:[#allocation10 + $0x10] sm:$0xf] }
  0x76   :  { %875 = vmatpush.bf16.msrb.mxu2 %v2090_v6  ;;  %889 = vmatpush.bf16.msrb.mxu3 %v2094_v7  ;;  %v2914_v6 = vld [vmem:[#allocation10 + $0x14] sm:$0xf0]  ;;  %v2546_v7 = vor.u32 %v2966_v4, %v2545_v2  ;;  %v2571_v2 = vld [vmem:[#allocation10 + $0x1e8] sm:$0xf0]  ;;  %v2919_v4 = vld [vmem:[#allocation10 + $0x44] sm:$0xf] }
  0x77   :  { %v2338_v8 = vor.u32 %v2914_v6, %v2337_v5  ;;  %v2363_v5 = vld [vmem:[#allocation10 + $0x48] sm:$0xf0]  ;;  %v2935_v6 = vld [vmem:[#allocation10 + $0xc4] sm:$0xf] }
  0x78   :  { %2323 = vmatmul.msk.bf16.vlgmr.msrb.gmra.mxu0 %vm755_vm3, %v3396_v51  ;;  %2324 = vmatmul.msk.bf16.vlgmr.msrb.gmra.mxu1 %vm755_vm3, %v3396_v51 }
  0x79   :  { %1344 = vmatpush.bf16.msra.mxu0 %v2386_v10  ;;  %1358 = vmatpush.bf16.msra.mxu1 %v2450_v11  ;;  %v2930_v10 = vld [vmem:[#allocation10 + $0x94] sm:$0xf0] }
  0x7a   :  { %2325 = vmatmul.msk.bf16.vlgmr.msrb.gmra.mxu2 %vm755_vm3, %v3396_v51  ;;  %2326 = vmatmul.msk.bf16.vlgmr.msrb.gmra.mxu3 %vm755_vm3, %v3396_v51  ;;  %v2426_v51 = vor.u32 %v2936_v37, %v2425_v36  ;;  %v2402_v11 = vor.u32 %v2930_v10, %v2401_v9  ;;  %v2379_v36 = vld [vmem:[#allocation10 + $0x68] sm:$0xf0]  ;;  %v2939_v37 = vld [vmem:[#allocation10 + $0xe4] sm:$0xf]  ;;  %v2953_v10 = vld [vmem:[#allocation10 + $0x154] sm:$0xf] }
  0x7b   :  { %1372 = vmatpush.bf16.msra.mxu2 %v2514_v17  ;;  %1386 = vmatpush.bf16.msra.mxu3 %v2578_v18  ;;  %v2912_v17 = vld [vmem:[#allocation10 + $0x4] sm:$0xf0]  ;;  %v2538_v18 = vor.u32 %v2964_v15, %v2537_v14  ;;  %v2563_v14 = vld [vmem:[#allocation10 + $0x1d8] sm:$0xf0] }
  0x7d   :  { %1345 = vmatpush.bf16.msra.mxu0 %v2378_v19  ;;  %1359 = vmatpush.bf16.msra.mxu1 %v2442_v20  ;;  %v2330_v19 = vor.u32 %v2912_v17, %v2329_v16  ;;  %v2393_v20 = vld [vmem:[#allocation10 + $0x80] sm:$0xf]  ;;  %v2566_v16 = vor.u32 %v2969_v12, %v2563_v14  ;;  %v2917_v17 = vld [vmem:[#allocation10 + $0x34] sm:$0xf] }
  0x7e   :  { %v2394_v22 = vor.u32 %v2928_v21, %v2393_v20  ;;  %v2933_v20 = vld [vmem:[#allocation10 + $0xb4] sm:$0xf]  ;;  %v2419_v21 = vld [vmem:[#allocation10 + $0xb8] sm:$0xf0] }
  0x7f   :  { %1373 = vmatpush.bf16.msra.mxu2 %v2506_v30  ;;  %1387 = vmatpush.bf16.msra.mxu3 %v2570_v34  ;;  %v2530_v34 = vor.u32 %v2962_v33, %v2529_v32  ;;  %v2347_v32 = vld [vmem:[#allocation10 + $0x28] sm:$0xf0]  ;;  %v2931_v33 = vld [vmem:[#allocation10 + $0xa4] sm:$0xf] }
  0x81   :  { %1346 = vmatpush.bf16.msra.mxu0 %v2370_v25  ;;  %1360 = vmatpush.bf16.msra.mxu1 %v2434_v26  ;;  %v2941_v25 = vld [vmem:[#allocation10 + $0xf4] sm:$0xf]  ;;  %v2390_v26 = vor.u32 %v2925_v23, %v2387_v24  ;;  %v2951_v23 = vld [vmem:[#allocation10 + $0x144] sm:$0xf]  ;;  %v2491_v24 = vld [vmem:[#allocation10 + $0x148] sm:$0xf0] }
  0x82   :  { %v2454_v30 = vor.u32 %v2941_v25, %v2451_v27  ;;  %v2967_v25 = vld [vmem:[#allocation10 + $0x1c4] sm:$0xf]  ;;  %v2494_v28 = vor.u32 %v2951_v23, %v2491_v24 }
  0x83   :  { %1374 = vmatpush.bf16.msra.mxu2 %v2498_v41  ;;  %1388 = vmatpush.bf16.msra.mxu3 %v2562_v45  ;;  %v2446_v41 = vor.u32 %v2939_v37, %v2443_v38  ;;  %v2957_v45 = vld [vmem:[#allocation10 + $0x174] sm:$0xf] }
  0x84   :  { %v2518_v52 = vor.u32 %v2957_v45, %v2515_v47  ;;  %v2949_v37 = vld [vmem:[#allocation10 + $0x134] sm:$0xf] }
  0x85   :  { %1347 = vmatpush.bf16.msra.mxu0 %v2362_v35  ;;  %1361 = vmatpush.bf16.msra.mxu1 %v2426_v51  ;;  %v2923_v35 = vld [vmem:[#allocation10 + $0x64] sm:$0xf] }
  0x86   :  { %v2382_v51 = vor.u32 %v2923_v35, %v2379_v36  ;;  %v2411_v35 = vld [vmem:[#allocation10 + $0xa8] sm:$0xf0] }
  0x87   :  { %1375 = vmatpush.bf16.msra.mxu2 %v2490_v55  ;;  %1389 = vmatpush.bf16.msra.mxu3 %v2554_v59  ;;  %v2371_v55 = vld [vmem:[#allocation10 + $0x58] sm:$0xf0]  ;;  %v2438_v59 = vor.u32 %v2937_v56, %v2435_v58  ;;  %v2414_v36 = vor.u32 %v2931_v33, %v2411_v35  ;;  %v2539_v56 = vld [vmem:[#allocation10 + $0x1a8] sm:$0xf0]  ;;  %v2911_v58 = vld [vmem:[#allocation10 + $0x4] sm:$0xf] }
  0x88   :  { %v2374_v57 = vor.u32 %v2921_v54, %v2371_v55  ;;  %v2963_v54 = vld [vmem:[#allocation10 + $0x1a4] sm:$0xf] }
  0x89   :  { %1348 = vmatpush.bf16.msra.mxu0 %v2354_v46  ;;  %1362 = vmatpush.bf16.msra.mxu1 %v2418_v49  ;;  %v2522_v46 = vor.u32 %v2960_v44, %v2521_v43  ;;  %v2579_v49 = vld [vmem:[#allocation10 + $0x1f8] sm:$0xf0]  ;;  %v2929_v44 = vld [vmem:[#allocation10 + $0x94] sm:$0xf] }
  0x8a   :  { %v2582_v53 = vor.u32 %v2973_v48, %v2579_v49  ;;  %v2339_v43 = vld [vmem:[#allocation10 + $0x18] sm:$0xf0] }
  0x8b   :  { %1376 = vmatpush.bf16.msra.mxu2 %v2482_v3  ;;  %1390 = vmatpush.bf16.msra.mxu3 %v2546_v7  ;;  %v2574_v3 = vor.u32 %v2971_v62, %v2571_v2  ;;  %v2366_v7 = vor.u32 %v2919_v4, %v2363_v5  ;;  %v2403_v48 = vld [vmem:[#allocation10 + $0x98] sm:$0xf0]  ;;  %v2395_v2 = vld [vmem:[#allocation10 + $0x88] sm:$0xf0]  ;;  %v2945_v4 = vld [vmem:[#allocation10 + $0x114] sm:$0xf] }
  0x8c   :  { %v2406_v49 = vor.u32 %v2929_v44, %v2403_v48  ;;  %v2467_v5 = vld [vmem:[#allocation10 + $0x118] sm:$0xf0] }
  0x8d   :  { %1349 = vmatpush.bf16.msra.mxu0 %v2346_v60  ;;  %1363 = vmatpush.bf16.msra.mxu1 %v2410_v63  ;;  %v2955_v60 = vld [vmem:[#allocation10 + $0x164] sm:$0xf] }
  0x8e   :  { %v2510_v1 = vor.u32 %v2955_v60, %v2507_v61  ;;  %v2927_v60 = vld [vmem:[#allocation10 + $0x84] sm:$0xf] }
  0x8f   :  { %1377 = vmatpush.bf16.msra.mxu2 %v2474_v50  ;;  %1391 = vmatpush.bf16.msra.mxu3 %v2538_v18  ;;  %v2355_v18 = vld [vmem:[#allocation10 + $0x38] sm:$0xf0] }
  0x91   :  { %1350 = vmatpush.bf16.msra.mxu0 %v2338_v8  ;;  %1364 = vmatpush.bf16.msra.mxu1 %v2402_v11  ;;  %v2427_v8 = vld [vmem:[#allocation10 + $0xc8] sm:$0xf0]  ;;  %v2499_v11 = vld [vmem:[#allocation10 + $0x158] sm:$0xf0] }
  0x92   :  { %v2430_v9 = vor.u32 %v2935_v6, %v2427_v8  ;;  %v2502_v13 = vor.u32 %v2953_v10, %v2499_v11  ;;  %v2961_v6 = vld [vmem:[#allocation10 + $0x194] sm:$0xf]  ;;  %v2470_v8 = vor.u32 %v2945_v4, %v2467_v5  ;;  %v2943_v10 = vld [vmem:[#allocation10 + $0x104] sm:$0xf]  ;;  %v2459_v11 = vld [vmem:[#allocation10 + $0x108] sm:$0xf0] }
  0x93   :  { %1378 = vmatpush.bf16.msra.mxu2 %v2466_v31  ;;  %1392 = vmatpush.bf16.msra.mxu3 %v2530_v34  ;;  %v2915_v31 = vld [vmem:[#allocation10 + $0x24] sm:$0xf]  ;;  %v2462_v14 = vor.u32 %v2943_v10, %v2459_v11 }
  0x94   :  { %v2350_v34 = vor.u32 %v2915_v31, %v2347_v32 }
  0x95   :  { %1351 = vmatpush.bf16.msra.mxu0 %v2330_v19  ;;  %1365 = vmatpush.bf16.msra.mxu1 %v2394_v22  ;;  %v2358_v19 = vor.u32 %v2917_v17, %v2355_v18  ;;  %v2422_v22 = vor.u32 %v2933_v20, %v2419_v21  ;;  %v2523_v17 = vld [vmem:[#allocation10 + $0x188] sm:$0xf0] }
  0x97   :  { %1379 = vmatpush.bf16.msra.mxu2 %v2458_v42  ;;  %1393 = vmatpush.bf16.msra.mxu3 %v2522_v46  ;;  %v2913_v42 = vld [vmem:[#allocation10 + $0x14] sm:$0xf] }
  0x98   :  { %v2342_v47 = vor.u32 %v2913_v42, %v2339_v43  ;;  %v2705_v42 = vld [vmem:[#allocation12 + $0xf0] sm:$0xf]  ;;  %v3006_v43 = vld [vmem:[#allocation12 + $0xf4] sm:$0xf0] }
  0x99   :  { %1400 = vmatpush.bf16.msrb.mxu0 %v2390_v26  ;;  %1414 = vmatpush.bf16.msrb.mxu1 %v2454_v30  ;;  %v2558_v30 = vor.u32 %v2967_v25, %v2555_v29  ;;  %v3446_v25 = vld [vmem:[#allocation9] sm:$0xff] }
  0x9a   :  { %v898_v29 = vperm.slane %v3446_v25, 0  ;;  %v899_v31 = vperm.slane %v3446_v25, 1  ;;  %v900_v44 = vperm.slane %v3446_v25, 2  ;;  %v901_v48 = vperm.slane %v3446_v25, 3 }
  0x9b   :  { %1428 = vmatpush.bf16.msrb.mxu2 %v2518_v52  ;;  %1442 = vmatpush.bf16.msrb.mxu3 %v2582_v53  ;;  %v2947_v52 = vld [vmem:[#allocation10 + $0x124] sm:$0xf]  ;;  %v2475_v53 = vld [vmem:[#allocation10 + $0x128] sm:$0xf0] }
  0x9c   :  { %v2478_v55 = vor.u32 %v2947_v52, %v2475_v53 }
  0x9d   :  { %1401 = vmatpush.bf16.msrb.mxu0 %v2382_v51  ;;  %1415 = vmatpush.bf16.msrb.mxu1 %v2446_v41  ;;  %v2483_v51 = vld [vmem:[#allocation10 + $0x138] sm:$0xf0]  ;;  %v2550_v41 = vor.u32 %v2965_v39, %v2547_v40  ;;  %v2641_v39 = vld [vmem:[#allocation12 + $0x70] sm:$0xf] }
  0x9e   :  { %v2486_v38 = vor.u32 %v2949_v37, %v2483_v51 }
  0x9f   :  { %1429 = vmatpush.bf16.msrb.mxu2 %v2510_v1  ;;  %1443 = vmatpush.bf16.msrb.mxu3 %v2574_v3  ;;  %v2398_v3 = vor.u32 %v2927_v60, %v2395_v2  ;;  %v2697_v60 = vld [vmem:[#allocation12 + $0xe0] sm:$0xf] }
  0xa1   :  { %1402 = vmatpush.bf16.msrb.mxu0 %v2374_v57  ;;  %1416 = vmatpush.bf16.msrb.mxu1 %v2438_v59  ;;  %v2542_v57 = vor.u32 %v2963_v54, %v2539_v56  ;;  %v2331_v59 = vld [vmem:[#allocation10 + $0x8] sm:$0xf0]  ;;  %v2988_v56 = vld [vmem:[#allocation12 + $0x64] sm:$0xf0] }
  0xa2   :  { %v2334_v1 = vor.u32 %v2911_v58, %v2331_v59 }
  0xa3   :  { %1430 = vmatpush.bf16.msrb.mxu2 %v2502_v13  ;;  %1444 = vmatpush.bf16.msrb.mxu3 %v2566_v16  ;;  %v2959_v16 = vld [vmem:[#allocation10 + $0x184] sm:$0xf] }
  0xa4   :  { %v2526_v18 = vor.u32 %v2959_v16, %v2523_v17  ;;  %v2625_v16 = vld [vmem:[#allocation12 + $0x50] sm:$0xf]  ;;  %v2986_v17 = vld [vmem:[#allocation12 + $0x54] sm:$0xf0] }
  0xa5   :  { %1403 = vmatpush.bf16.msrb.mxu0 %v2366_v7  ;;  %1417 = vmatpush.bf16.msrb.mxu1 %v2430_v9  ;;  %v2531_v7 = vld [vmem:[#allocation10 + $0x198] sm:$0xf0] }
  0xa6   :  { %v2534_v9 = vor.u32 %v2961_v6, %v2531_v7  ;;  %v2769_v6 = vld [vmem:[#allocation12 + $0x170] sm:$0xf]  ;;  %v3022_v7 = vld [vmem:[#allocation12 + $0x174] sm:$0xf0] }
  0xa7   :  { %1431 = vmatpush.bf16.msrb.mxu2 %v2494_v28  ;;  %1445 = vmatpush.bf16.msrb.mxu3 %v2558_v30 }
  0xa9   :  { %1404 = vmatpush.bf16.msrb.mxu0 %v2358_v19  ;;  %1418 = vmatpush.bf16.msrb.mxu1 %v2422_v22 }
  0xab   :  { %1432 = vmatpush.bf16.msrb.mxu2 %v2486_v38  ;;  %1446 = vmatpush.bf16.msrb.mxu3 %v2550_v41 }
  0xad   :  { %v3414_v63 = vpop.f32.mrf.mxu0  ;;  %v3416_v0 = vpop.f32.mrf.mxu1  ;;  %1405 = vmatpush.bf16.msrb.mxu0 %v2350_v34  ;;  %1419 = vmatpush.bf16.msrb.mxu1 %v2414_v36 }
  0xaf   :  { %1433 = vmatpush.bf16.msrb.mxu2 %v2478_v55  ;;  %1447 = vmatpush.bf16.msrb.mxu3 %v2542_v57  ;;  %v2633_v55 = vld [vmem:[#allocation12 + $0x60] sm:$0xf] }
  0xb0   :  { %v2634_v5 = vor.u32 %v2988_v56, %v2633_v55 }
  0xb1   :  { %1406 = vmatpush.bf16.msrb.mxu0 %v2342_v47  ;;  %1420 = vmatpush.bf16.msrb.mxu1 %v2406_v49 }
  0xb3   :  { %1434 = vmatpush.bf16.msrb.mxu2 %v2470_v8  ;;  %1448 = vmatpush.bf16.msrb.mxu3 %v2534_v9  ;;  %v2833_v8 = vld [vmem:[#allocation12 + $0x1f0] sm:$0xf] }
  0xb5   :  { %v3422_v26 = vpop.f32.mrf.mxu0  ;;  %v3424_v27 = vpop.f32.mrf.mxu1  ;;  %1407 = vmatpush.bf16.msrb.mxu0 %v2334_v1  ;;  %1421 = vmatpush.bf16.msrb.mxu1 %v2398_v3  ;;  %v3004_v1 = vld [vmem:[#allocation12 + $0xe4] sm:$0xf0] }
  0xb6   :  { %v3418_v50 = vpop.f32.mrf.mxu2  ;;  %v3420_v15 = vpop.f32.mrf.mxu3  ;;  %v2698_v11 = vor.u32 %v3004_v1, %v2697_v60  ;;  %v3016_v60 = vld [vmem:[#allocation12 + $0x144] sm:$0xf0]  ;;  %v2809_v1 = vld [vmem:[#allocation12 + $0x1c0] sm:$0xf] }
  0xb7   :  { %1435 = vmatpush.bf16.msrb.mxu2 %v2462_v14  ;;  %1449 = vmatpush.bf16.msrb.mxu3 %v2526_v18  ;;  %v3038_v14 = vld [vmem:[#allocation12 + $0x1f4] sm:$0xf0]  ;;  %v2689_v18 = vld [vmem:[#allocation12 + $0xd0] sm:$0xf] }
  0xbd   :  { %v3430_v61 = vpop.f32.mrf.mxu0  ;;  %v3432_v62 = vpop.f32.mrf.mxu1 }
  0xbe   :  { %v3426_v45 = vpop.f32.mrf.mxu2  ;;  %v3428_v46 = vpop.f32.mrf.mxu3 }
  0xc5   :  { %v3438_v19 = vpop.f32.mrf.mxu0  ;;  %v3440_v20 = vpop.f32.mrf.mxu1 }
  0xc6   :  { %v3434_v12 = vpop.f32.mrf.mxu2  ;;  %v3436_v13 = vpop.f32.mrf.mxu3 }
  0xce   :  { %v3442_v21 = vpop.f32.mrf.mxu2  ;;  %v3444_v22 = vpop.f32.mrf.mxu3 }
  0xd5   :  { %v793_v23 = vpop.f32.mrf.mxu0  ;;  %v807_v24 = vpop.f32.mrf.mxu1 }
  0xd6   :  { %v794_v28 = vadd.f32 %v793_v23, %v3414_v63  ;;  %v808_v30 = vadd.f32 %v807_v24, %v3416_v0  ;;  %v2990_v63 = vld [vmem:[#allocation12 + $0x74] sm:$0xf0] }
  0xd7   :  { %v2642_v54 = vor.u32 %v2990_v63, %v2641_v39  ;;  %v2984_v39 = vld [vmem:[#allocation12 + $0x44] sm:$0xf0] }
  0xd8   :  { %v914_v36 = vadd.f32 %v898_v29, %v794_v28  ;;  %v915_v37 = vadd.f32 %v899_v31, %v808_v30  ;;  %v2834_v30 = vor.u32 %v3038_v14, %v2833_v8  ;;  %v902_v8 = vperm.slane %v3446_v25, 4  ;;  %v2737_v14 = vld [vmem:[#allocation12 + $0x130] sm:$0xf] }
  0xda   :  { %v930_v49 = vmax.f32 %v914_v36, 0.0  ;;  %v931_v52 = vmax.f32 %v915_v37, 0.0  ;;  %v2825_v37 = vld [vmem:[#allocation12 + $0x1e0] sm:$0xf] }
  0xdd   :  { %v795_v34 = vpop.f32.mrf.mxu0  ;;  %v809_v35 = vpop.f32.mrf.mxu1 }
  0xde   :  { %v821_v32 = vpop.f32.mrf.mxu2  ;;  %v835_v33 = vpop.f32.mrf.mxu3  ;;  %v796_v51 = vadd.f32 %v795_v34, %v3422_v26  ;;  %v810_v38 = vadd.f32 %v809_v35, %v3424_v27  ;;  %v2706_v27 = vor.u32 %v3006_v43, %v2705_v42  ;;  %v2753_v43 = vld [vmem:[#allocation12 + $0x150] sm:$0xf] }
  0xdf   :  { %v822_v0 = vadd.f32 %v821_v32, %v3418_v50  ;;  %v836_v47 = vadd.f32 %v835_v33, %v3420_v15  ;;  %v2761_v32 = vld [vmem:[#allocation12 + $0x160] sm:$0xf]  ;;  %v3020_v33 = vld [vmem:[#allocation12 + $0x164] sm:$0xf0] }
  0xe0   :  { %v922_v40 = vadd.f32 %v898_v29, %v796_v51  ;;  %v923_v41 = vadd.f32 %v899_v31, %v810_v38  ;;  %v2770_v29 = vor.u32 %v3022_v7, %v2769_v6  ;;  %v2626_v31 = vor.u32 %v2986_v17, %v2625_v16  ;;  %v3036_v51 = vld [vmem:[#allocation12 + $0x1e4] sm:$0xf0]  ;;  %v2617_v38 = vld [vmem:[#allocation12 + $0x40] sm:$0xf]  ;;  %v3014_v16 = vld [vmem:[#allocation12 + $0x134] sm:$0xf0] }
  0xe1   :  { %v916_v2 = vadd.f32 %v900_v44, %v822_v0  ;;  %v917_v15 = vadd.f32 %v901_v48, %v836_v47  ;;  %v2762_v63 = vor.u32 %v3020_v33, %v2761_v32  ;;  %v2826_v42 = vor.u32 %v3036_v51, %v2825_v37  ;;  %v3018_v47 = vld [vmem:[#allocation12 + $0x154] sm:$0xf0]  ;;  %v2665_v6 = vld [vmem:[#allocation12 + $0xa0] sm:$0xf]  ;;  %v2996_v7 = vld [vmem:[#allocation12 + $0xa4] sm:$0xf0] }
  0xe2   :  { %v938_v53 = vmax.f32 %v922_v40, 0.0  ;;  %v939_v26 = vmax.f32 %v923_v41, 0.0  ;;  %v2681_v40 = vld [vmem:[#allocation12 + $0xc0] sm:$0xf]  ;;  %v3000_v41 = vld [vmem:[#allocation12 + $0xc4] sm:$0xf0]  ;;  %v2618_v0 = vor.u32 %v2984_v39, %v2617_v38  ;;  %v2754_v56 = vor.u32 %v3018_v47, %v2753_v43 }
  0xe3   :  { %v932_v23 = vmax.f32 %v916_v2, 0.0  ;;  %v3032_v2 = vld [vmem:[#allocation12 + $0x1c4] sm:$0xf0]  ;;  %v2801_v17 = vld [vmem:[#allocation12 + $0x1b0] sm:$0xf] }
  0xe4   :  { %v3458_v57 = vpack.c.bf16 %v938_v53, %v930_v49  ;;  %v3460_v58 = vpack.c.bf16 %v939_v26, %v931_v52  ;;  %v3034_v49 = vld [vmem:[#allocation12 + $0x1d4] sm:$0xf0]  ;;  %v2609_v52 = vld [vmem:[#allocation12 + $0x30] sm:$0xf]  ;;  %v2729_v32 = vld [vmem:[#allocation12 + $0x120] sm:$0xf] }
  0xe5   :  { %v2982_v53 = vld [vmem:[#allocation12 + $0x34] sm:$0xf0]  ;;  %v2673_v26 = vld [vmem:[#allocation12 + $0xb0] sm:$0xf]  ;;  %v3012_v33 = vld [vmem:[#allocation12 + $0x124] sm:$0xf0] }
  0xe6   :  { %v823_v59 = vpop.f32.mrf.mxu2  ;;  %v837_v50 = vpop.f32.mrf.mxu3  ;;  %1352 = vmatmul.bf16.vlgmr.msra.gmra.mxu0 %v3458_v57  ;;  %1366 = vmatmul.bf16.vlgmr.msra.gmra.mxu1 %v3460_v58  ;;  %v2793_v51 = vld [vmem:[#allocation12 + $0x1a0] sm:$0xf]  ;;  %v3028_v38 = vld [vmem:[#allocation12 + $0x1a4] sm:$0xf0] }
  0xe7   :  { %v824_v3 = vadd.f32 %v823_v59, %v3426_v45  ;;  %v838_v4 = vadd.f32 %v837_v50, %v3428_v46  ;;  %1850 = vmatpush.bf16.msra.mxu0 %v2642_v54  ;;  %1864 = vmatpush.bf16.msra.mxu1 %v2706_v27  ;;  %v3002_v45 = vld [vmem:[#allocation12 + $0xd4] sm:$0xf0]  ;;  %v933_v46 = vmax.f32 %v917_v15, 0.0  ;;  %v2745_v50 = vld [vmem:[#allocation12 + $0x140] sm:$0xf]  ;;  %v2610_v15 = vor.u32 %v2982_v53, %v2609_v52 }
  0xe8   :  { %v2690_v36 = vor.u32 %v3002_v45, %v2689_v18  ;;  %v2998_v54 = vld [vmem:[#allocation12 + $0xb4] sm:$0xf0]  ;;  %v3476_v39 = vld [vmem:[#allocation12] sm:$0xf]  ;;  %v2976_v43 = vld [vmem:[#allocation12 + $0x4] sm:$0xf0] }
  0xe9   :  { %v924_v9 = vadd.f32 %v900_v44, %v824_v3  ;;  %v925_v10 = vadd.f32 %v901_v48, %v838_v4  ;;  %v2682_v44 = vor.u32 %v3000_v41, %v2681_v40  ;;  %v2817_v48 = vld [vmem:[#allocation12 + $0x1d0] sm:$0xf]  ;;  %v2674_v3 = vor.u32 %v2998_v54, %v2673_v26  ;;  %v2601_v4 = vld [vmem:[#allocation12 + $0x20] sm:$0xf]  ;;  %v3030_v18 = vld [vmem:[#allocation12 + $0x1b4] sm:$0xf0] }
  0xea   :  { %v2818_v59 = vor.u32 %v3034_v49, %v2817_v48  ;;  %v2802_v37 = vor.u32 %v3030_v18, %v2801_v17  ;;  %v2989_v49 = vld [vmem:[#allocation12 + $0x74] sm:$0xf]  ;;  %v2643_v52 = vld [vmem:[#allocation12 + $0x78] sm:$0xf0] }
  0xeb   :  { %v940_v24 = vmax.f32 %v924_v9, 0.0  ;;  %v941_v28 = vmax.f32 %v925_v10, 0.0  ;;  %1851 = vmatpush.bf16.msra.mxu0 %v2634_v5  ;;  %1865 = vmatpush.bf16.msra.mxu1 %v2698_v11  ;;  %v2980_v5 = vld [vmem:[#allocation12 + $0x24] sm:$0xf0]  ;;  %v903_v9 = vperm.slane %v3446_v25, 5  ;;  %v2746_v10 = vor.u32 %v3016_v60, %v2745_v50 }
  0xec   :  { %v2810_v11 = vor.u32 %v3032_v2, %v2809_v1  ;;  %v2602_v45 = vor.u32 %v2980_v5, %v2601_v4  ;;  %v3005_v53 = vld [vmem:[#allocation12 + $0xf4] sm:$0xf]  ;;  %v2586_v1 = vor.u32 %v2976_v43, %v3476_v39  ;;  %v2987_v4 = vld [vmem:[#allocation12 + $0x64] sm:$0xf]  ;;  %v2635_v5 = vld [vmem:[#allocation12 + $0x68] sm:$0xf0] }
  0xed   :  { %v3466_v34 = vpack.c.bf16 %v940_v24, %v932_v23  ;;  %v3468_v35 = vpack.c.bf16 %v941_v28, %v933_v46  ;;  %v2666_v23 = vor.u32 %v2996_v7, %v2665_v6  ;;  %v2593_v46 = vld [vmem:[#allocation12 + $0x10] sm:$0xf]  ;;  %v2978_v24 = vld [vmem:[#allocation12 + $0x14] sm:$0xf0] }
  0xee   :  { %v2657_v28 = vld [vmem:[#allocation12 + $0x90] sm:$0xf]  ;;  %v2594_v47 = vor.u32 %v2978_v24, %v2593_v46  ;;  %v2777_v46 = vld [vmem:[#allocation12 + $0x180] sm:$0xf] }
  0xef   :  { %1380 = vmatmul.bf16.vlgmr.msra.gmra.mxu2 %v3466_v34  ;;  %1394 = vmatmul.bf16.vlgmr.msra.gmra.mxu3 %v3468_v35 }
  0xf0   :  { %1878 = vmatpush.bf16.msra.mxu2 %v2770_v29  ;;  %1892 = vmatpush.bf16.msra.mxu3 %v2834_v30 }
  0xf1   :  { %1852 = vmatpush.bf16.msra.mxu0 %v2626_v31  ;;  %1866 = vmatpush.bf16.msra.mxu1 %v2690_v36  ;;  %v2994_v31 = vld [vmem:[#allocation12 + $0x94] sm:$0xf0] }
  0xf2   :  { %v2658_v48 = vor.u32 %v2994_v31, %v2657_v28  ;;  %v2638_v28 = vor.u32 %v2987_v4, %v2635_v5  ;;  %v3021_v31 = vld [vmem:[#allocation12 + $0x174] sm:$0xf]  ;;  %v2611_v4 = vld [vmem:[#allocation12 + $0x38] sm:$0xf0] }
  0xf3   :  { %v2997_v5 = vld [vmem:[#allocation12 + $0xb4] sm:$0xf] }
  0xf4   :  { %1879 = vmatpush.bf16.msra.mxu2 %v2762_v63  ;;  %1893 = vmatpush.bf16.msra.mxu3 %v2826_v42 }
  0xf5   :  { %v849_v27 = vpop.f32.mrf.mxu0  ;;  %v863_v55 = vpop.f32.mrf.mxu1  ;;  %1853 = vmatpush.bf16.msra.mxu0 %v2618_v0  ;;  %1867 = vmatpush.bf16.msra.mxu1 %v2682_v44  ;;  %v2649_v0 = vld [vmem:[#allocation12 + $0x80] sm:$0xf]  ;;  %v2992_v44 = vld [vmem:[#allocation12 + $0x84] sm:$0xf0] }
  0xf6   :  { %1408 = vmatmul.bf16.vlgmr.msrb.gmra.mxu0 %v3458_v57  ;;  %1422 = vmatmul.bf16.vlgmr.msrb.gmra.mxu1 %v3460_v58  ;;  %v2738_v58 = vor.u32 %v3014_v16, %v2737_v14  ;;  %v850_v40 = vadd.f32 %v849_v27, %v3430_v61  ;;  %v864_v41 = vadd.f32 %v863_v55, %v3432_v62  ;;  %v2707_v61 = vld [vmem:[#allocation12 + $0xf8] sm:$0xf0]  ;;  %v2721_v62 = vld [vmem:[#allocation12 + $0x110] sm:$0xf]  ;;  %v2699_v16 = vld [vmem:[#allocation12 + $0xe8] sm:$0xf0] }
  0xf7   :  { %v2730_v27 = vor.u32 %v3012_v33, %v2729_v32  ;;  %v2794_v55 = vor.u32 %v3028_v38, %v2793_v51  ;;  %v2650_v2 = vor.u32 %v2992_v44, %v2649_v0  ;;  %v3019_v0 = vld [vmem:[#allocation12 + $0x164] sm:$0xf]  ;;  %v2763_v44 = vld [vmem:[#allocation12 + $0x168] sm:$0xf0] }
  0xf8   :  { %1880 = vmatpush.bf16.msra.mxu2 %v2754_v56  ;;  %1894 = vmatpush.bf16.msra.mxu3 %v2818_v59  ;;  %v2785_v56 = vld [vmem:[#allocation12 + $0x190] sm:$0xf]  ;;  %v3026_v59 = vld [vmem:[#allocation12 + $0x194] sm:$0xf0]  ;;  %v918_v50 = vadd.f32 %v902_v8, %v850_v40  ;;  %v919_v60 = vadd.f32 %v903_v9, %v864_v41  ;;  %v2627_v40 = vld [vmem:[#allocation12 + $0x58] sm:$0xf0] }
  0xf9   :  { %1854 = vmatpush.bf16.msra.mxu0 %v2610_v15  ;;  %1868 = vmatpush.bf16.msra.mxu1 %v2674_v3  ;;  %v2710_v15 = vor.u32 %v3005_v53, %v2707_v61  ;;  %v3001_v41 = vld [vmem:[#allocation12 + $0xd4] sm:$0xf]  ;;  %v2619_v61 = vld [vmem:[#allocation12 + $0x48] sm:$0xf0] }
  0xfa   :  { %v934_v24 = vmax.f32 %v918_v50, 0.0 }
  0xfc   :  { %1881 = vmatpush.bf16.msra.mxu2 %v2746_v10  ;;  %1895 = vmatpush.bf16.msra.mxu3 %v2810_v11 }
  0xfd   :  { %v877_v29 = vpop.f32.mrf.mxu2  ;;  %v891_v30 = vpop.f32.mrf.mxu3  ;;  %1855 = vmatpush.bf16.msra.mxu0 %v2602_v45  ;;  %1869 = vmatpush.bf16.msra.mxu1 %v2666_v23  ;;  %v2713_v45 = vld [vmem:[#allocation12 + $0x100] sm:$0xf]  ;;  %v3008_v23 = vld [vmem:[#allocation12 + $0x104] sm:$0xf0] }
  0xfe   :  { %v851_v57 = vpop.f32.mrf.mxu0  ;;  %v865_v36 = vpop.f32.mrf.mxu1  ;;  %v878_v6 = vadd.f32 %v877_v29, %v3434_v12  ;;  %v892_v17 = vadd.f32 %v891_v30, %v3436_v13  ;;  %v935_v12 = vmax.f32 %v919_v60, 0.0  ;;  %v3024_v29 = vld [vmem:[#allocation12 + $0x184] sm:$0xf0]  ;;  %v2771_v13 = vld [vmem:[#allocation12 + $0x178] sm:$0xf0] }
  0xff   :  { %v852_v63 = vadd.f32 %v851_v57, %v3438_v19  ;;  %v866_v42 = vadd.f32 %v865_v36, %v3440_v20  ;;  %1436 = vmatmul.bf16.vlgmr.msrb.gmra.mxu2 %v3466_v34  ;;  %1450 = vmatmul.bf16.vlgmr.msrb.gmra.mxu3 %v3468_v35  ;;  %v3010_v19 = vld [vmem:[#allocation12 + $0x114] sm:$0xf0]  ;;  %v904_v20 = vperm.slane %v3446_v25, 6  ;;  %v905_v34 = vperm.slane %v3446_v25, 7  ;;  %v3037_v30 = vld [vmem:[#allocation12 + $0x1f4] sm:$0xf] }
 0x100   :  { %1882 = vmatpush.bf16.msra.mxu2 %v2738_v58  ;;  %1896 = vmatpush.bf16.msra.mxu3 %v2802_v37  ;;  %v2646_v35 = vor.u32 %v2989_v49, %v2643_v52  ;;  %v2722_v3 = vor.u32 %v3010_v19, %v2721_v62  ;;  %v2714_v58 = vor.u32 %v3008_v23, %v2713_v45  ;;  %v2985_v37 = vld [vmem:[#allocation12 + $0x54] sm:$0xf]  ;;  %v3035_v49 = vld [vmem:[#allocation12 + $0x1e4] sm:$0xf]  ;;  %v2827_v52 = vld [vmem:[#allocation12 + $0x1e8] sm:$0xf0] }
 0x101   :  { %v926_v26 = vadd.f32 %v902_v8, %v852_v63  ;;  %v927_v54 = vadd.f32 %v903_v9, %v866_v42  ;;  %1856 = vmatpush.bf16.msra.mxu0 %v2594_v47  ;;  %1870 = vmatpush.bf16.msra.mxu1 %v2658_v48  ;;  %v2786_v8 = vor.u32 %v3026_v59, %v2785_v56  ;;  %v3003_v9 = vld [vmem:[#allocation12 + $0xe4] sm:$0xf]  ;;  %v2691_v63 = vld [vmem:[#allocation12 + $0xd8] sm:$0xf0]  ;;  %v3017_v59 = vld [vmem:[#allocation12 + $0x154] sm:$0xf] }
 0x102   :  { %v2702_v57 = vor.u32 %v3003_v9, %v2699_v16  ;;  %v920_v51 = vadd.f32 %v904_v20, %v878_v6  ;;  %v921_v38 = vadd.f32 %v905_v34, %v892_v17  ;;  %v2778_v39 = vor.u32 %v3024_v29, %v2777_v46  ;;  %v2675_v6 = vld [vmem:[#allocation12 + $0xb8] sm:$0xf0]  ;;  %v2811_v9 = vld [vmem:[#allocation12 + $0x1c8] sm:$0xf0]  ;;  %v2995_v45 = vld [vmem:[#allocation12 + $0xa4] sm:$0xf] }
 0x103   :  { %v942_v7 = vmax.f32 %v926_v26, 0.0  ;;  %v943_v10 = vmax.f32 %v927_v54, 0.0  ;;  %v2774_v42 = vor.u32 %v3021_v31, %v2771_v13  ;;  %v2630_v53 = vor.u32 %v2985_v37, %v2627_v40  ;;  %v2983_v54 = vld [vmem:[#allocation12 + $0x44] sm:$0xf]  ;;  %v2667_v23 = vld [vmem:[#allocation12 + $0xa8] sm:$0xf0] }
 0x104   :  { %1883 = vmatpush.bf16.msra.mxu2 %v2730_v27  ;;  %1897 = vmatpush.bf16.msra.mxu3 %v2794_v55  ;;  %v2694_v26 = vor.u32 %v3001_v41, %v2691_v63  ;;  %v936_v62 = vmax.f32 %v920_v51, 0.0  ;;  %v937_v19 = vmax.f32 %v921_v38, 0.0  ;;  %v2683_v27 = vld [vmem:[#allocation12 + $0xc8] sm:$0xf0]  ;;  %v2766_v55 = vor.u32 %v3019_v0, %v2763_v44  ;;  %v3029_v29 = vld [vmem:[#allocation12 + $0x1b4] sm:$0xf] }
 0x105   :  { %v879_v11 = vpop.f32.mrf.mxu2  ;;  %v893_v14 = vpop.f32.mrf.mxu3  ;;  %1857 = vmatpush.bf16.msra.mxu0 %v2586_v1  ;;  %1871 = vmatpush.bf16.msra.mxu1 %v2650_v2  ;;  %v3491_v36 = vpack.c.bf16 %v942_v7, %v934_v24  ;;  %v2830_v56 = vor.u32 %v3035_v49, %v2827_v52  ;;  %v2755_v1 = vld [vmem:[#allocation12 + $0x158] sm:$0xf0]  ;;  %v3033_v2 = vld [vmem:[#allocation12 + $0x1d4] sm:$0xf]  ;;  %v2678_v17 = vor.u32 %v2997_v5, %v2675_v6  ;;  %v3011_v51 = vld [vmem:[#allocation12 + $0x124] sm:$0xf] }
 0x106   :  { %v880_v25 = vadd.f32 %v879_v11, %v3442_v21  ;;  %v894_v18 = vadd.f32 %v893_v14, %v3444_v22  ;;  %v2835_v21 = vld [vmem:[#allocation12 + $0x1f8] sm:$0xf0]  ;;  %v3493_v22 = vpack.c.bf16 %v943_v10, %v935_v12  ;;  %v2758_v7 = vor.u32 %v3017_v59, %v2755_v1  ;;  %v3015_v11 = vld [vmem:[#allocation12 + $0x144] sm:$0xf]  ;;  %v2747_v14 = vld [vmem:[#allocation12 + $0x148] sm:$0xf0] }
 0x107   :  { %v2838_v43 = vor.u32 %v3037_v30, %v2835_v21  ;;  %v2750_v46 = vor.u32 %v3015_v11, %v2747_v14  ;;  %v3013_v12 = vld [vmem:[#allocation12 + $0x134] sm:$0xf]  ;;  %v2803_v31 = vld [vmem:[#allocation12 + $0x1b8] sm:$0xf0]  ;;  %v2731_v38 = vld [vmem:[#allocation12 + $0x128] sm:$0xf0] }
 0x108   :  { %v928_v32 = vadd.f32 %v904_v20, %v880_v25  ;;  %v929_v33 = vadd.f32 %v905_v34, %v894_v18  ;;  %1884 = vmatpush.bf16.msra.mxu2 %v2722_v3  ;;  %1898 = vmatpush.bf16.msra.mxu3 %v2786_v8  ;;  %v2999_v20 = vld [vmem:[#allocation12 + $0xc4] sm:$0xf]  ;;  %v2819_v34 = vld [vmem:[#allocation12 + $0x1d8] sm:$0xf0]  ;;  %v2981_v3 = vld [vmem:[#allocation12 + $0x34] sm:$0xf]  ;;  %v2806_v37 = vor.u32 %v3029_v29, %v2803_v31 }
 0x109   :  { %1906 = vmatpush.bf16.msrb.mxu0 %v2646_v35  ;;  %1920 = vmatpush.bf16.msrb.mxu1 %v2710_v15  ;;  %v2622_v35 = vor.u32 %v2983_v54, %v2619_v61  ;;  %v2686_v15 = vor.u32 %v2999_v20, %v2683_v27  ;;  %v2822_v10 = vor.u32 %v3033_v2, %v2819_v34  ;;  %v3031_v8 = vld [vmem:[#allocation12 + $0x1c4] sm:$0xf]  ;;  %v2603_v18 = vld [vmem:[#allocation12 + $0x28] sm:$0xf0]  ;;  %v2595_v13 = vld [vmem:[#allocation12 + $0x18] sm:$0xf0] }
 0x10a   :  { %1858 = vmatmul.bf16.vlgmr.msra.gmra.mxu0 %v3491_v36  ;;  %1872 = vmatmul.bf16.vlgmr.msra.gmra.mxu1 %v3493_v22  ;;  %v944_v47 = vmax.f32 %v928_v32, 0.0  ;;  %v945_v48 = vmax.f32 %v929_v33, 0.0  ;;  %v2614_v16 = vor.u32 %v2981_v3, %v2611_v4  ;;  %v2979_v25 = vld [vmem:[#allocation12 + $0x24] sm:$0xf]  ;;  %v2814_v24 = vor.u32 %v3031_v8, %v2811_v9  ;;  %v2993_v30 = vld [vmem:[#allocation12 + $0x94] sm:$0xf] }
 0x10b   :  { %v2606_v32 = vor.u32 %v2979_v25, %v2603_v18  ;;  %v2670_v33 = vor.u32 %v2995_v45, %v2667_v23  ;;  %v2659_v21 = vld [vmem:[#allocation12 + $0x98] sm:$0xf0]  ;;  %v2795_v40 = vld [vmem:[#allocation12 + $0x1a8] sm:$0xf0]  ;;  %v2991_v0 = vld [vmem:[#allocation12 + $0x84] sm:$0xf] }
 0x10c   :  { %1885 = vmatpush.bf16.msra.mxu2 %v2714_v58  ;;  %1899 = vmatpush.bf16.msra.mxu3 %v2778_v39  ;;  %v3497_v50 = vpack.c.bf16 %v944_v47, %v936_v62  ;;  %v3499_v60 = vpack.c.bf16 %v945_v48, %v937_v19  ;;  %v3027_v39 = vld [vmem:[#allocation12 + $0x1a4] sm:$0xf]  ;;  %v2662_v63 = vor.u32 %v2993_v30, %v2659_v21  ;;  %v2651_v44 = vld [vmem:[#allocation12 + $0x88] sm:$0xf0]  ;;  %v3009_v49 = vld [vmem:[#allocation12 + $0x114] sm:$0xf] }
 0x10d   :  { %1907 = vmatpush.bf16.msrb.mxu0 %v2638_v28  ;;  %1921 = vmatpush.bf16.msrb.mxu1 %v2702_v57  ;;  %v2739_v28 = vld [vmem:[#allocation12 + $0x138] sm:$0xf0]  ;;  %v2977_v57 = vld [vmem:[#allocation12 + $0x14] sm:$0xf]  ;;  %v2734_v47 = vor.u32 %v3011_v51, %v2731_v38  ;;  %v2798_v48 = vor.u32 %v3027_v39, %v2795_v40  ;;  %v2654_v61 = vor.u32 %v2991_v0, %v2651_v44  ;;  %v3007_v20 = vld [vmem:[#allocation12 + $0x104] sm:$0xf] }
 0x10e   :  { %v2742_v58 = vor.u32 %v3013_v12, %v2739_v28  ;;  %v2598_v41 = vor.u32 %v2977_v57, %v2595_v13  ;;  %v2723_v52 = vld [vmem:[#allocation12 + $0x118] sm:$0xf0]  ;;  %v2715_v27 = vld [vmem:[#allocation12 + $0x108] sm:$0xf0] }
 0x10f   :  { %1886 = vmatmul.bf16.vlgmr.msra.gmra.mxu2 %v3497_v50  ;;  %1900 = vmatmul.bf16.vlgmr.msra.gmra.mxu3 %v3499_v60  ;;  %v2726_v62 = vor.u32 %v3009_v49, %v2723_v52  ;;  %v2718_v59 = vor.u32 %v3007_v20, %v2715_v27 }
 0x110   :  { %1934 = vmatpush.bf16.msrb.mxu2 %v2774_v42  ;;  %1948 = vmatpush.bf16.msrb.mxu3 %v2838_v43  ;;  %v2975_v42 = vld [vmem:[#allocation12 + $0x4] sm:$0xf]  ;;  %v2587_v43 = vld [vmem:[#allocation12 + $0x8] sm:$0xf0] }
 0x111   :  { %1908 = vmatpush.bf16.msrb.mxu0 %v2630_v53  ;;  %1922 = vmatpush.bf16.msrb.mxu1 %v2694_v26  ;;  %v3025_v53 = vld [vmem:[#allocation12 + $0x194] sm:$0xf]  ;;  %v2787_v26 = vld [vmem:[#allocation12 + $0x198] sm:$0xf0]  ;;  %v2590_v54 = vor.u32 %v2975_v42, %v2587_v43 }
 0x112   :  { %v2790_v19 = vor.u32 %v3025_v53, %v2787_v26  ;;  %v1524_v26 = vld [vmem:[#allocation13] sm:$0x3] }
 0x114   :  { %1935 = vmatpush.bf16.msrb.mxu2 %v2766_v55  ;;  %1949 = vmatpush.bf16.msrb.mxu3 %v2830_v56  ;;  %v3023_v55 = vld [vmem:[#allocation12 + $0x184] sm:$0xf]  ;;  %v2779_v56 = vld [vmem:[#allocation12 + $0x188] sm:$0xf0] }
 0x115   :  { %1909 = vmatpush.bf16.msrb.mxu0 %v2622_v35  ;;  %1923 = vmatpush.bf16.msrb.mxu1 %v2686_v15  ;;  %v2782_v1 = vor.u32 %v3023_v55, %v2779_v56  ;;  %v1018_v15 = vld [vmem:[%s3534_s6] sm:$0x3]  ;;  %v1527_v55 = vperm.slane %v1524_v26, 1 }
 0x116   :  { %v1020_v5 = vperm.slane %v1018_v15, 0 }
 0x118   :  { %1936 = vmatpush.bf16.msrb.mxu2 %v2758_v7  ;;  %1950 = vmatpush.bf16.msrb.mxu3 %v2822_v10 }
 0x119   :  { %1910 = vmatpush.bf16.msrb.mxu0 %v2614_v16  ;;  %1924 = vmatpush.bf16.msrb.mxu1 %v2678_v17 }
 0x11c   :  { %1937 = vmatpush.bf16.msrb.mxu2 %v2750_v46  ;;  %1951 = vmatpush.bf16.msrb.mxu3 %v2814_v24 }
 0x11d   :  { %1911 = vmatpush.bf16.msrb.mxu0 %v2606_v32  ;;  %1925 = vmatpush.bf16.msrb.mxu1 %v2670_v33 }
 0x120   :  { %1938 = vmatpush.bf16.msrb.mxu2 %v2742_v58  ;;  %1952 = vmatpush.bf16.msrb.mxu3 %v2806_v37 }
 0x121   :  { %1912 = vmatpush.bf16.msrb.mxu0 %v2598_v41  ;;  %1926 = vmatpush.bf16.msrb.mxu1 %v2662_v63 }
 0x124   :  { %1939 = vmatpush.bf16.msrb.mxu2 %v2734_v47  ;;  %1953 = vmatpush.bf16.msrb.mxu3 %v2798_v48 }
 0x125   :  { %1913 = vmatpush.bf16.msrb.mxu0 %v2590_v54  ;;  %1927 = vmatpush.bf16.msrb.mxu1 %v2654_v61 }
 0x128   :  { %1940 = vmatpush.bf16.msrb.mxu2 %v2726_v62  ;;  %1954 = vmatpush.bf16.msrb.mxu3 %v2790_v19  ;;  %v1526_v62 = vperm.slane %v1524_v26, 0 }
 0x129   :  { %1914 = vmatmul.bf16.vlgmr.msrb.gmra.mxu0 %v3491_v36  ;;  %1928 = vmatmul.bf16.vlgmr.msrb.gmra.mxu1 %v3493_v22  ;;  %v1021_v22 = vperm.slane %v1018_v15, 1 }
 0x12c   :  { %1941 = vmatpush.bf16.msrb.mxu2 %v2718_v59  ;;  %1955 = vmatpush.bf16.msrb.mxu3 %v2782_v1 }
 0x12f   :  { %1942 = vmatmul.bf16.vlgmr.msrb.gmra.mxu2 %v3497_v50  ;;  %1956 = vmatmul.bf16.vlgmr.msrb.gmra.mxu3 %v3499_v60  ;;  %v3513_v60 = vld [vmem:[%s3537_s9] sm:$0xf] }
 0x130   :  { %v1968_v17 = vperm.slane %v3513_v60, 0  ;;  %v1969_v25 = vperm.slane %v3513_v60, 2 }
 0x132   :  { %v1972_v29 = vperm.slane %v1968_v17, 0  ;;  %v1973_v31 = vperm.slane %v1969_v25, 0 }
 0x163   :  { %v1353_v2 = vpop.f32.mrf.mxu0  ;;  %v1367_v34 = vpop.f32.mrf.mxu1 }
 0x164   :  { %v1354_v36 = vadd.f32 %v1353_v2, %v1020_v5 }
 0x166   :  { %v1368_v14 = vadd.f32 %v1367_v34, %v1354_v36 }
 0x16b   :  { %v1355_v35 = vpop.f32.mrf.mxu0  ;;  %v1369_v6 = vpop.f32.mrf.mxu1 }
 0x16c   :  { %v1356_v16 = vadd.f32 %v1355_v35, %v1020_v5 }
 0x16e   :  { %v1370_v12 = vadd.f32 %v1369_v6, %v1356_v16 }
 0x172   :  { %v1381_v3 = vpop.f32.mrf.mxu2  ;;  %v1395_v4 = vpop.f32.mrf.mxu3 }
 0x173   :  { %v1409_v7 = vpop.f32.mrf.mxu0  ;;  %v1382_v50 = vadd.f32 %v1381_v3, %v1368_v14  ;;  %v1423_v9 = vpop.f32.mrf.mxu1  ;;  %v1984_v3 = vperm.slane %v3513_v60, 1 }
 0x174   :  { %v1410_v8 = vadd.f32 %v1409_v7, %v1021_v22 }
 0x175   :  { %v1396_v18 = vadd.f32 %v1395_v4, %v1382_v50  ;;  %v1985_v4 = vperm.slane %v3513_v60, 3  ;;  %v1988_v14 = vperm.slane %v1984_v3, 1 }
 0x176   :  { %v1424_v45 = vadd.f32 %v1423_v9, %v1410_v8 }
 0x177   :  { %v1456_v32 = vmax.f32 %v1396_v18, 0.0  ;;  %v1989_v50 = vperm.slane %v1985_v4, 1 }
 0x179   :  { %v1974_v51 = vmul.f32 %v1972_v29, %v1456_v32 }
 0x17a   :  { %v1383_v10 = vpop.f32.mrf.mxu2  ;;  %v1397_v11 = vpop.f32.mrf.mxu3 }
 0x17b   :  { %v1411_v23 = vpop.f32.mrf.mxu0  ;;  %v1384_v33 = vadd.f32 %v1383_v10, %v1370_v12  ;;  %v1425_v21 = vpop.f32.mrf.mxu1 }
 0x17c   :  { %v1412_v57 = vadd.f32 %v1411_v23, %v1021_v22 }
 0x17d   :  { %v1398_v58 = vadd.f32 %v1397_v11, %v1384_v33 }
 0x17e   :  { %v1426_v37 = vadd.f32 %v1425_v21, %v1412_v57  ;;  %v2000_v21 = vlaneseq }
 0x17f   :  { %v1458_v42 = vmax.f32 %v1398_v58, 0.0 }
 0x180   :  { %v2001_v58 = vand.u32 127, %v2000_v21 }
 0x181   :  { %v1976_v44 = vmul.f32 %v1972_v29, %v1458_v42 }
 0x182   :  { %v1437_v46 = vpop.f32.mrf.mxu2  ;;  %v1451_v24 = vpop.f32.mrf.mxu3  ;;  %vm2002_vm4 = vcmp.eq.s32.totalorder %v2001_v58, 0 }
 0x183   :  { %v1438_v28 = vadd.f32 %v1437_v46, %v1424_v45 }
 0x185   :  { %v1452_v13 = vadd.f32 %v1451_v24, %v1438_v28 }
 0x187   :  { %v1457_v30 = vmax.f32 %v1452_v13, 0.0  ;;  %v1859_v48 = vpop.f32.mrf.mxu0  ;;  %v1873_v52 = vpop.f32.mrf.mxu1 }
 0x188   :  { %v1860_v20 = vadd.f32 %v1859_v48, %v1526_v62 }
 0x189   :  { %v1975_v38 = vmul.f32 %v1973_v31, %v1457_v30 }
 0x18a   :  { %v1439_v39 = vpop.f32.mrf.mxu2  ;;  %v1453_v63 = vpop.f32.mrf.mxu3  ;;  %v1874_v1 = vadd.f32 %v1873_v52, %v1860_v20 }
 0x18b   :  { %v1440_v40 = vadd.f32 %v1439_v39, %v1426_v37  ;;  %v1978_v41 = vadd.f32 %v1975_v38, %v1974_v51  ;;  %v3051_v51 = vld [vmem:[%s3538_s10] ss:$0 sm:$0xff] }
 0x18d   :  { %v1454_v43 = vadd.f32 %v1453_v63, %v1440_v40  ;;  %1979 = vadd.xlane.f32.xlu0 %v1978_v41 }
 0x18f   :  { %v1459_v0 = vmax.f32 %v1454_v43, 0.0  ;;  %v1861_v53 = vpop.f32.mrf.mxu0  ;;  %v1875_v19 = vpop.f32.mrf.mxu1 }
 0x190   :  { %v1862_v15 = vadd.f32 %v1861_v53, %v1526_v62 }
 0x191   :  { %v1977_v47 = vmul.f32 %v1973_v31, %v1459_v0 }
 0x192   :  { %v1887_v54 = vpop.f32.mrf.mxu2  ;;  %v1901_v61 = vpop.f32.mrf.mxu3  ;;  %v1876_v10 = vadd.f32 %v1875_v19, %v1862_v15 }
 0x193   :  { %v1981_v49 = vadd.f32 %v1977_v47, %v1976_v44  ;;  %v1888_v2 = vadd.f32 %v1887_v54, %v1874_v1 }
 0x195   :  { %1982 = vadd.xlane.f32.xlu0 %v1981_v49  ;;  %v1902_v5 = vadd.f32 %v1901_v61, %v1888_v2 }
 0x197   :  { %v1962_v8 = vmax.f32 %v1902_v5, 0.0 }
 0x199   :  { %v1990_v46 = vmul.f32 %v1988_v14, %v1962_v8 }
 0x19a   :  { %v1889_v56 = vpop.f32.mrf.mxu2  ;;  %v1903_v59 = vpop.f32.mrf.mxu3 }
 0x19b   :  { %v1890_v9 = vadd.f32 %v1889_v56, %v1876_v10 }
 0x19d   :  { %v1904_v45 = vadd.f32 %v1903_v59, %v1890_v9 }
 0x19f   :  { %v1964_v31 = vmax.f32 %v1904_v45, 0.0 }
 0x1a1   :  { %v1992_v57 = vmul.f32 %v1988_v14, %v1964_v31 }
 0x1a6   :  { %v1915_v27 = vpop.f32.mrf.mxu0  ;;  %v1929_v35 = vpop.f32.mrf.mxu1 }
 0x1a7   :  { %v1916_v34 = vadd.f32 %v1915_v27, %v1527_v55 }
 0x1a9   :  { %v1930_v6 = vadd.f32 %v1929_v35, %v1916_v34 }
 0x1ae   :  { %v1917_v36 = vpop.f32.mrf.mxu0  ;;  %v1931_v18 = vpop.f32.mrf.mxu1 }
 0x1af   :  { %v1918_v16 = vadd.f32 %v1917_v36, %v1527_v55 }
 0x1b1   :  { %v1932_v23 = vadd.f32 %v1931_v18, %v1918_v16 }
 0x1b2   :  { %v1943_v7 = vpop.f32.mrf.mxu2  ;;  %v1957_v22 = vpop.f32.mrf.mxu3 }
 0x1b3   :  { %v1944_v11 = vadd.f32 %v1943_v7, %v1930_v6 }
 0x1b5   :  { %v1958_v17 = vadd.f32 %v1957_v22, %v1944_v11 }
 0x1b7   :  { %v1963_v25 = vmax.f32 %v1958_v17, 0.0 }
 0x1b9   :  { %v1991_v24 = vmul.f32 %v1989_v50, %v1963_v25 }
 0x1ba   :  { %v1945_v60 = vpop.f32.mrf.mxu2  ;;  %v1959_v29 = vpop.f32.mrf.mxu3 }
 0x1bb   :  { %v1946_v12 = vadd.f32 %v1945_v60, %v1932_v23  ;;  %v1994_v28 = vadd.f32 %v1991_v24, %v1990_v46 }
 0x1bd   :  { %v1960_v32 = vadd.f32 %v1959_v29, %v1946_v12  ;;  %1995 = vadd.xlane.f32.xlu1 %v1994_v28 }
 0x1bf   :  { %v1965_v33 = vmax.f32 %v1960_v32, 0.0 }
 0x1c1   :  { %v1993_v13 = vmul.f32 %v1989_v50, %v1965_v33 }
 0x1c3   :  { %v1997_v30 = vadd.f32 %v1993_v13, %v1992_v57 }
 0x1c5   :  { %1998 = vadd.xlane.f32.xlu1 %v1997_v30 }
 0x200   :  { %v1980_v37 = vpop.xlane.xlu0 %1979 }
 0x208   :  { %v1983_v41 = vpop.xlane.xlu0 %1982 }
 0x230   :  { %v1996_v38 = vpop.xlane.xlu1 %1995 }
 0x231   :  { %v2003_v39 = vsel %vm2002_vm4, %v1980_v37, %v1996_v38 }
 0x232   :  { %v2009_v40 = vadd.f32 %v3051_v51, %v2003_v39 }
 0x234   :  { %2012 = vst.msk [vmem:[%s3539_s11] sm:$0xff] %vm2011_vm5, %v2009_v40 }
 0x238   :  { %v1999_v63 = vpop.xlane.xlu1 %1998 }
 0x239   :  { %v2004_v42 = vsel %vm2002_vm4, %v1983_v41, %v1999_v63 }
 0x23a   :  { %v2010_v43 = vadd.f32 %v3051_v51, %v2004_v42 }
 0x23c   :  { %2013 = vst.msk [vmem:[%s3539_s11 + $0x8] sm:$0xff] %vm2011_vm5, %v2010_v43 }
 0x23d   :  { %2018 = vsyncpa [#allocation3], 1 }
 0x23e   :  { %2019 = vsyncpa [#allocation5], 1 }
 0x23f   :  { %2020 = vsyncpa [#allocation8], 1 }
 0x240   :  { %2021 = vsyncpa [#allocation11], 1 }
 0x241   :  { %2022 = vsyncpa [#allocation14], 1 }

</bundles_post_ra>
